<compile_context>
chip_gen: v6e
topology: v6e:2x2x1
jax: 0.10.0
libtpu: 0.0.40
codegen_flags: <defaults>
</compile_context>

<pallas_src>
import math
from functools import partial

import jax
import jax.numpy as jnp
from jax import lax
from jax.experimental import pallas as pl
from jax.experimental.pallas import tpu as pltpu

_LANE = 128
_SUBLANE = 8
_Q_ALIGN = 32          # keeps int8 mask / bf16 q-scratch sublane-tiling safe


def _round_up(x, m):
    return ((x + m - 1) // m) * m


def _pad2d(a, rows, cols, dtype=None):
    out = jnp.pad(a, ((0, rows - a.shape[0]), (0, cols - a.shape[1])))
    return out if dtype is None else out.astype(dtype)


def _nbytes(shape, dtype):
    n = 1
    for s in shape:
        n *= int(s)
    return n * jnp.dtype(dtype).itemsize


# ---------------------------------------------------------------------------
# Kernel: flash-style online masked softmax over key tiles + residual/LN/FFN.
# Grid: (direction, query-row tile, key tile [arbitrary]).
# ---------------------------------------------------------------------------
def _attention_kernel(x_ref, kt_ref, v_ref, mask_ref,
                      wq_ref, w1_ref, w2_ref,
                      g1_ref, b1_ref, g2_ref, b2_ref,
                      out_ref,
                      q_sc, m_sc, l_sc, acc_sc,
                      *, size, matmul_dtype):
    f32 = jnp.float32
    j = pl.program_id(2)

    # ---- first key tile of this query tile: project q once, reset stats ----
    # wq already holds (W_q / sqrt(size)).T padded -> canonical (M,K)x(K,N).
    @pl.when(j == 0)
    def _():
        q = jnp.dot(x_ref[0].astype(matmul_dtype), wq_ref[0],
                    preferred_element_type=f32)
        q_sc[...] = q.astype(matmul_dtype)
        m_sc[...] = jnp.full(m_sc.shape, -jnp.inf, f32)
        l_sc[...] = jnp.zeros(l_sc.shape, f32)
        acc_sc[...] = jnp.zeros(acc_sc.shape, f32)

    # ---- online masked softmax over this key tile ----
    # torch: ex = exp(score) * mask; attn = ex / (sum(ex) + 1e-6).
    # Running-max shift is exactly compensated in the 1e-6 term at finalize.
    score = jnp.dot(q_sc[...], kt_ref[0], preferred_element_type=f32)  # [tq,tk]
    m_prev = m_sc[...]
    m_new = jnp.maximum(m_prev, jnp.max(score, axis=-1, keepdims=True))
    alpha = jnp.exp(m_prev - m_new)
    ex = jnp.exp(score - m_new) * mask_ref[0].astype(f32)
    l_sc[...] = alpha * l_sc[...] + jnp.sum(ex, axis=-1, keepdims=True)
    acc_sc[...] = alpha * acc_sc[...] + jnp.dot(
        ex.astype(matmul_dtype), v_ref[0], preferred_element_type=f32)
    m_sc[...] = m_new

    # ---- last key tile: normalize, residual + LN, FFN, residual + LN ----
    @pl.when(j == pl.num_programs(2) - 1)
    def _():
        inv_h = f32(1.0 / size)
        denom = l_sc[...] + f32(1e-6) * jnp.exp(-m_sc[...])
        # (ex/denom)@v == (ex@v) * (1/denom): one EUP reciprocal + broadcast mul.
        x_atten = acc_sc[...] * pl.reciprocal(denom, approx=True)
        # dropout -> identity (eval mode)

        def layer_norm(h, g_ref, b_ref):
            # Padded lanes of h are zero, so E[h^2]-mu^2 with 1/size is exact.
            mu = jnp.sum(h, axis=-1, keepdims=True) * inv_h
            var = jnp.sum(h * h, axis=-1, keepdims=True) * inv_h - mu * mu
            return (h - mu) * lax.rsqrt(var + f32(1e-5)) * g_ref[0] + b_ref[0]

        h1 = layer_norm(x_ref[0] + x_atten, g1_ref, b1_ref)
        ff = jnp.maximum(jnp.dot(h1.astype(matmul_dtype), w1_ref[0],
                                 preferred_element_type=f32), 0.0)
        ff = jnp.dot(ff.astype(matmul_dtype), w2_ref[0],
                     preferred_element_type=f32)
        # dropout -> identity (eval mode)
        out_ref[0] = layer_norm(h1 + ff, g2_ref, b2_ref).astype(out_ref.dtype)


# ---------------------------------------------------------------------------
# pallas_call runner over stacked directions.
# ---------------------------------------------------------------------------
def _fused_attention_call(x, kt, v, mask, kparams, *, size, tile_q, tile_k,
                          matmul_dtype):
    """x: [D,pq,hp] f32; kt: [D,hp,pk] md; v: [D,pk,hp] md; mask: [D,pq,pk] i8;
    kparams: wq,w1,w2 [D,hp,hp] md and g1,b1,g2,b2 [D,1,hp] f32."""
    d, pq, hp = x.shape
    pk = v.shape[1]
    n_q = pq // tile_q
    n_k = pk // tile_k
    grid = (d, n_q, n_k)

    q_rows = lambda di, i, j: (di, i, 0)
    kt_cols = lambda di, i, j: (di, 0, j)
    v_rows = lambda di, i, j: (di, j, 0)
    qk_tile = lambda di, i, j: (di, i, j)
    d_only = lambda di, i, j: (di, 0, 0)

    in_specs = [
        pl.BlockSpec((1, tile_q, hp), q_rows),        # x (query rows)
        pl.BlockSpec((1, hp, tile_k), kt_cols),       # K^T (streamed key tiles)
        pl.BlockSpec((1, tile_k, hp), v_rows),        # V   (streamed key tiles)
        pl.BlockSpec((1, tile_q, tile_k), qk_tile),   # mask (int8)
        pl.BlockSpec((1, hp, hp), d_only),            # wq (pre-scaled, [in,out])
        pl.BlockSpec((1, hp, hp), d_only),            # w1
        pl.BlockSpec((1, hp, hp), d_only),            # w2
        pl.BlockSpec((1, 1, hp), d_only),             # g1
        pl.BlockSpec((1, 1, hp), d_only),             # b1
        pl.BlockSpec((1, 1, hp), d_only),             # g2
        pl.BlockSpec((1, 1, hp), d_only),             # b2
    ]
    out_spec = pl.BlockSpec((1, tile_q, hp), q_rows)

    scratch_shapes = [
        pltpu.VMEM((tile_q, hp), matmul_dtype),       # q (per query tile)
        pltpu.VMEM((tile_q, 1), jnp.float32),         # running max
        pltpu.VMEM((tile_q, 1), jnp.float32),         # running denom
        pltpu.VMEM((tile_q, hp), jnp.float32),        # PV accumulator
    ]

    # Accurate VMEM budget: 2 buffers per pipelined block + scratch + slack.
    wb = jnp.dtype(matmul_dtype).itemsize
    block_bytes = (
        _nbytes((tile_q, hp), jnp.float32)            # x
        + _nbytes((hp, tile_k), matmul_dtype)         # K^T
        + _nbytes((tile_k, hp), matmul_dtype)         # V
        + _nbytes((tile_q, tile_k), jnp.int8)         # mask
        + 3 * _nbytes((hp, hp), matmul_dtype)         # wq, w1, w2
        + 4 * _nbytes((1, hp), jnp.float32)           # LN affines
        + _nbytes((tile_q, hp), jnp.float32)          # out
    )
    scratch_bytes = (_nbytes((tile_q, hp), matmul_dtype)
                     + 2 * _nbytes((tile_q, _LANE), jnp.float32)
                     + _nbytes((tile_q, hp), jnp.float32))
    need = 2 * block_bytes + scratch_bytes + (2 << 20)
    vmem_limit = int(min(max(need, 16 << 20), 48 << 20))   # <=48MiB: v7x-safe

    flops = d * (2 * pq * hp * hp + 4 * pq * pk * hp + 4 * pq * hp * hp)
    transcendentals = d * (pq * pk + 3 * pq * n_k + pq)
    bytes_accessed = int(d * (2 * pq * hp * 4                 # x in + out
                              + n_q * 2 * pk * hp * wb        # K^T,V per q-tile
                              + pq * pk                       # int8 mask
                              + 3 * hp * hp * wb + 4 * hp * 4))

    return pl.pallas_call(
        partial(_attention_kernel, size=size, matmul_dtype=matmul_dtype),
        grid_spec=pltpu.PrefetchScalarGridSpec(
            num_scalar_prefetch=0, grid=grid,
            in_specs=in_specs, out_specs=out_spec,
            scratch_shapes=scratch_shapes),
        out_shape=jax.ShapeDtypeStruct((d, pq, hp), jnp.float32),
        compiler_params=pltpu.CompilerParams(
            dimension_semantics=("parallel", "parallel", "arbitrary"),
            vmem_limit_bytes=vmem_limit),
        cost_estimate=pl.CostEstimate(
            flops=int(flops), transcendentals=int(transcendentals),
            bytes_accessed=bytes_accessed),
    )(x, kt, v, mask, *kparams)


# ---------------------------------------------------------------------------
# Parameter prep (done ONCE, not per forward call).
# ---------------------------------------------------------------------------
def make_attention_params(key, size):
    """Deterministic parameter init mirroring Attention.__init__ shapes
    (torch [out, in] weight layout)."""
    ks = jax.random.split(key, 5)
    scale = 1.0 / math.sqrt(size)
    wq = jax.random.uniform(ks[0], (size, size), jnp.float32, -scale, scale)
    wk = jax.random.uniform(ks[1], (size, size), jnp.float32, -scale, scale)
    wv = jax.random.uniform(ks[2], (size, size), jnp.float32, -scale, scale)
    w1 = jax.random.uniform(ks[3], (size, size), jnp.float32, -scale, scale)
    w2 = jax.random.uniform(ks[4], (size, size), jnp.float32, -scale, scale)
    g1 = jnp.ones((size,), jnp.float32)
    b1 = jnp.zeros((size,), jnp.float32)
    g2 = jnp.ones((size,), jnp.float32)
    b2 = jnp.zeros((size,), jnp.float32)
    return (wq, wk, wv, w1, w2, g1, b1, g2, b2)


def prepare_attention_params(params, *, size, matmul_dtype=jnp.bfloat16):
    """Transpose torch [out,in] weights to [in,out], pad to the lane-dense
    size and cast ONCE; fold 1/sqrt(size) into the q weight."""
    hp = _round_up(size, _LANE)
    wq, wk, wv, w1, w2, g1, b1, g2, b2 = params
    scale = jnp.float32(1.0 / math.sqrt(size))
    pad_t = lambda w: _pad2d(w.astype(jnp.float32).T, hp, hp, matmul_dtype)
    pad_v = lambda v: jnp.pad(v.astype(jnp.float32), (0, hp - size)).reshape(1, hp)
    return (pad_t(wq * scale), pad_t(wk), pad_t(wv), pad_t(w1), pad_t(w2),
            pad_v(g1), pad_v(b1), pad_v(g2), pad_v(b2))


def _precompute_kv(y_pad_f32, wk_p, wv_p, matmul_dtype):
    """One fused [pk,hp]x[hp,2hp] matmul per direction; K returned transposed."""
    hp = wk_p.shape[1]
    wkv = jnp.concatenate([wk_p, wv_p], axis=1)
    kv = jnp.dot(y_pad_f32.astype(matmul_dtype), wkv.astype(matmul_dtype),
                 preferred_element_type=jnp.float32)
    k = kv[:, :hp]
    v = kv[:, hp:]
    return k.T.astype(matmul_dtype), v.astype(matmul_dtype)


def _choose_tiles(rows, keys, tile_q_cap, tile_k_cap):
    if rows <= tile_q_cap:
        tile_q = _round_up(max(rows, 1), _Q_ALIGN)
        pq = tile_q
    else:
        tile_q = tile_q_cap
        pq = _round_up(rows, tile_q)
    if keys <= tile_k_cap:
        tile_k = _round_up(max(keys, 1), _LANE)
        pk = tile_k
    else:
        tile_k = tile_k_cap
        pk = _round_up(keys, tile_k)
    return tile_q, pq, tile_k, pk


_KERNEL_PARAM_IDX = (0, 3, 4, 5, 6, 7, 8)   # wq, w1, w2, g1, b1, g2, b2


# ---------------------------------------------------------------------------
# Forward wrappers.
# ---------------------------------------------------------------------------
def attention_forward(x, y, mask, prepared_params, *, size,
                      matmul_dtype=jnp.bfloat16, tile_q_cap=256, tile_k_cap=512):
    """One Attention.forward (single direction) via the fused kernel."""
    n = x.shape[0]
    m_rows = y.shape[0]
    hp = _round_up(size, _LANE)
    tile_q, pq, tile_k, pk = _choose_tiles(n, m_rows, tile_q_cap, tile_k_cap)

    xs = _pad2d(x.astype(jnp.float32), pq, hp)[None]
    y_pad = _pad2d(y.astype(jnp.float32), pk, hp)
    kt, v = _precompute_kv(y_pad, prepared_params[1], prepared_params[2],
                           matmul_dtype)
    ms = _pad2d(mask, pq, pk).astype(jnp.int8)[None]
    kparams = [prepared_params[i][None] for i in _KERNEL_PARAM_IDX]
    out = _fused_attention_call(xs, kt[None], v[None], ms, kparams, size=size,
                                tile_q=tile_q, tile_k=tile_k,
                                matmul_dtype=matmul_dtype)
    return out[0, :n, :size]


def attention_block_forward(nodes, edges, incidence, prepared_e2v, prepared_v2e,
                            *, size, matmul_dtype=jnp.bfloat16,
                            tile_q_cap=256, tile_k_cap=512):
    """AttentionBlock.forward: both directions fused into ONE pallas_call.
    Direction 0: nodes attend over edges; direction 1: edges attend over nodes."""
    n = nodes.shape[0]
    e = edges.shape[0]
    hp = _round_up(size, _LANE)
    rows = max(n, e)
    tile_q, pq, tile_k, pk = _choose_tiles(rows, rows, tile_q_cap, tile_k_cap)

    nodes32 = nodes.astype(jnp.float32)
    edges32 = edges.astype(jnp.float32)
    x = jnp.stack([_pad2d(nodes32, pq, hp), _pad2d(edges32, pq, hp)])

    kt0, v0 = _precompute_kv(_pad2d(edges32, pk, hp),
                             prepared_e2v[1], prepared_e2v[2], matmul_dtype)
    kt1, v1 = _precompute_kv(_pad2d(nodes32, pk, hp),
                             prepared_v2e[1], prepared_v2e[2], matmul_dtype)
    kt = jnp.stack([kt0, kt1])
    v = jnp.stack([v0, v1])

    mask = jnp.stack([_pad2d(incidence, pq, pk).astype(jnp.int8),
                      _pad2d(incidence.T, pq, pk).astype(jnp.int8)])
    kparams = [jnp.stack([prepared_e2v[i], prepared_v2e[i]])
               for i in _KERNEL_PARAM_IDX]

    out = _fused_attention_call(x, kt, v, mask, kparams, size=size,
                                tile_q=tile_q, tile_k=tile_k,
                                matmul_dtype=matmul_dtype)
    return out[0, :n, :size], out[1, :e, :size]


# ---------------------------------------------------------------------------
# Pure-JAX reference of the torch semantics (eval mode) for validation.
# ---------------------------------------------------------------------------
def _reference_attention(x, y, mask, params, size, matmul_dtype=jnp.float32):
    wq, wk, wv, w1, w2, g1, b1, g2, b2 = params
    c = lambda a: a.astype(matmul_dtype)
    dot = lambda a, b: jnp.dot(c(a), c(b), preferred_element_type=jnp.float32)
    q = dot(x, wq.T)
    k = dot(y, wk.T)
    v = dot(y, wv.T)
    score = dot(q, k.T) / math.sqrt(size)
    ex = jnp.exp(score) * mask
    attn = ex / (jnp.sum(ex, axis=1, keepdims=True) + 1e-6)
    x_atten = dot(attn, v)
    h = x + x_atten
    mu = h.mean(-1, keepdims=True)
    var = ((h - mu) ** 2).mean(-1, keepdims=True)
    h = (h - mu) / jnp.sqrt(var + 1e-5) * g1 + b1
    ff = dot(jnp.maximum(dot(h, w1.T), 0.0), w2.T)
    h2 = h + ff
    mu2 = h2.mean(-1, keepdims=True)
    var2 = ((h2 - mu2) ** 2).mean(-1, keepdims=True)
    return (h2 - mu2) / jnp.sqrt(var2 + 1e-5) * g2 + b2


if __name__ == "__main__":
    SIZE = 32        # hidden size h
    N_NODES = 16
    N_EDGES = 24

    root = jax.random.PRNGKey(0)
    k_nodes, k_edges, k_mask, k_p1, k_p2 = jax.random.split(root, 5)

    nodes = jax.random.normal(k_nodes, (N_NODES, SIZE), jnp.float32)
    edges = jax.random.normal(k_edges, (N_EDGES, SIZE), jnp.float32)
    incidence = (jax.random.uniform(k_mask, (N_NODES, N_EDGES)) > 0.3).astype(jnp.float32)

    params_e2v = make_attention_params(k_p1, SIZE)
    params_v2e = make_attention_params(k_p2, SIZE)

    # f32 MXU path: exact torch semantics (approx EUP reciprocal + online
    # softmax rescaling are the only numeric differences).
    prep_e2v_f32 = prepare_attention_params(params_e2v, size=SIZE, matmul_dtype=jnp.float32)
    prep_v2e_f32 = prepare_attention_params(params_v2e, size=SIZE, matmul_dtype=jnp.float32)
    nn_f32, ne_f32 = attention_block_forward(nodes, edges, incidence,
                                             prep_e2v_f32, prep_v2e_f32,
                                             size=SIZE, matmul_dtype=jnp.float32)
    jax.block_until_ready((nn_f32, ne_f32))
    ref_nodes = _reference_attention(nodes, edges, incidence, params_e2v, SIZE)
    ref_edges = _reference_attention(edges, nodes, incidence.T, params_v2e, SIZE)
    assert jnp.allclose(nn_f32, ref_nodes, atol=5e-3, rtol=5e-3)
    assert jnp.allclose(ne_f32, ref_edges, atol=5e-3, rtol=5e-3)

    # bf16 MXU path (production default on v6e/v7x): compare against a
    # reference that applies the same bf16 casts at the dot inputs.
    prep_e2v = prepare_attention_params(params_e2v, size=SIZE)
    prep_v2e = prepare_attention_params(params_v2e, size=SIZE)
    new_nodes, new_edges = attention_block_forward(nodes, edges, incidence,
                                                   prep_e2v, prep_v2e, size=SIZE)
    jax.block_until_ready((new_nodes, new_edges))
    ref_nodes_bf = _reference_attention(nodes, edges, incidence, params_e2v, SIZE,
                                        matmul_dtype=jnp.bfloat16)
    ref_edges_bf = _reference_attention(edges, nodes, incidence.T, params_v2e, SIZE,
                                        matmul_dtype=jnp.bfloat16)
    assert jnp.allclose(new_nodes, ref_nodes_bf, atol=2e-2, rtol=2e-2)
    assert jnp.allclose(new_edges, ref_edges_bf, atol=2e-2, rtol=2e-2)

    # Single-direction Attention.forward wrapper (same kernel, D=1).
    single = attention_forward(nodes, edges, incidence, prep_e2v, size=SIZE)
    jax.block_until_ready(single)
    assert jnp.allclose(single, ref_nodes_bf, atol=2e-2, rtol=2e-2)

    print("KERNEL_OK")
</pallas_src>

<mosaic_0001>
module attributes {stable_mosaic.version = 11 : i64} {
  func.func @_attention_kernel(%arg0: i32, %arg1: i32, %arg2: i32, %arg3: memref<1x32x128xf32, #tpu.memory_space<vmem>>, %arg4: memref<1x128x128xf32, #tpu.memory_space<vmem>>, %arg5: memref<1x128x128xf32, #tpu.memory_space<vmem>>, %arg6: memref<1x32x128xi8, #tpu.memory_space<vmem>>, %arg7: memref<1x128x128xf32, #tpu.memory_space<vmem>>, %arg8: memref<1x128x128xf32, #tpu.memory_space<vmem>>, %arg9: memref<1x128x128xf32, #tpu.memory_space<vmem>>, %arg10: memref<1x1x128xf32, #tpu.memory_space<vmem>>, %arg11: memref<1x1x128xf32, #tpu.memory_space<vmem>>, %arg12: memref<1x1x128xf32, #tpu.memory_space<vmem>>, %arg13: memref<1x1x128xf32, #tpu.memory_space<vmem>>, %arg14: memref<1x32x128xf32, #tpu.memory_space<vmem>>, %arg15: memref<32x128xf32, #tpu.memory_space<vmem>>, %arg16: memref<32x1xf32, #tpu.memory_space<vmem>>, %arg17: memref<32x1xf32, #tpu.memory_space<vmem>>, %arg18: memref<32x128xf32, #tpu.memory_space<vmem>>) attributes {dimension_semantics = [#tpu.dimension_semantics<parallel>, #tpu.dimension_semantics<parallel>, #tpu.dimension_semantics<arbitrary>], iteration_bounds = array<i64: 2, 1, 1>, scalar_prefetch = 0 : i64, scratch_operands = 4 : i64, tpu.core_type = #tpu.core_type<tc>, window_params = [{transform_indices = @transform_0, window_bounds = array<i64: 1, 32, 128>}, {transform_indices = @transform_1, window_bounds = array<i64: 1, 128, 128>}, {transform_indices = @transform_2, window_bounds = array<i64: 1, 128, 128>}, {transform_indices = @transform_3, window_bounds = array<i64: 1, 32, 128>}, {transform_indices = @transform_4, window_bounds = array<i64: 1, 128, 128>}, {transform_indices = @transform_5, window_bounds = array<i64: 1, 128, 128>}, {transform_indices = @transform_6, window_bounds = array<i64: 1, 128, 128>}, {transform_indices = @transform_7, window_bounds = array<i64: 1, 1, 128>}, {transform_indices = @transform_8, window_bounds = array<i64: 1, 1, 128>}, {transform_indices = @transform_9, window_bounds = array<i64: 1, 1, 128>}, {transform_indices = @transform_10, window_bounds = array<i64: 1, 1, 128>}, {transform_indices = @transform_11, window_bounds = array<i64: 1, 32, 128>}]} {
    %c0_i32 = arith.constant 0 : i32
    %0 = arith.cmpi eq, %arg2, %c0_i32 : i32
    %1 = arith.extui %0 : i1 to i32
    %c0_i32_0 = arith.constant 0 : i32
    %2 = arith.cmpi ne, %1, %c0_i32_0 : i32
    scf.if %2 {
      %c0_28 = arith.constant 0 : index
      %c0_29 = arith.constant 0 : index
      %c0_30 = arith.constant 0 : index
      %38 = vector.load %arg3[%c0_28, %c0_29, %c0_30] : memref<1x32x128xf32, #tpu.memory_space<vmem>>, vector<1x32x128xf32>
      %39 = vector.shape_cast %38 : vector<1x32x128xf32> to vector<32x128xf32>
      %c0_31 = arith.constant 0 : index
      %c0_32 = arith.constant 0 : index
      %c0_33 = arith.constant 0 : index
      %40 = vector.load %arg7[%c0_31, %c0_32, %c0_33] : memref<1x128x128xf32, #tpu.memory_space<vmem>>, vector<1x128x128xf32>
      %41 = vector.shape_cast %40 : vector<1x128x128xf32> to vector<128x128xf32>
      %cst_34 = arith.constant dense<0.000000e+00> : vector<32x128xf32>
      %42 = tpu.matmul %39, %41, %cst_34 {dimension_numbers = #tpu.dot_dimension_numbers<[1], [0], [0], [1], [0, 0, 1, 1], [], []>} : vector<32x128xf32>, vector<128x128xf32>, vector<32x128xf32> -> vector<32x128xf32>
      %c0_35 = arith.constant 0 : index
      %c0_36 = arith.constant 0 : index
      %43 = vector.load %arg15[%c0_35, %c0_36] : memref<32x128xf32, #tpu.memory_space<vmem>>, vector<32x128xf32>
      tpu.vector_store %arg15[%c0_35, %c0_36], %42 {strides = array<i32>} : memref<32x128xf32, #tpu.memory_space<vmem>>, vector<32x128xf32>,
      %cst_37 = arith.constant 0xFF800000 : f32
      %44 = vector.broadcast %cst_37 : f32 to vector<32x1xf32>
      %c0_38 = arith.constant 0 : index
      %c0_39 = arith.constant 0 : index
      %45 = vector.load %arg16[%c0_38, %c0_39] : memref<32x1xf32, #tpu.memory_space<vmem>>, vector<32x1xf32>
      tpu.vector_store %arg16[%c0_38, %c0_39], %44 {strides = array<i32>} : memref<32x1xf32, #tpu.memory_space<vmem>>, vector<32x1xf32>,
      %cst_40 = arith.constant 0.000000e+00 : f32
      %46 = vector.broadcast %cst_40 : f32 to vector<32x1xf32>
      %c0_41 = arith.constant 0 : index
      %c0_42 = arith.constant 0 : index
      %47 = vector.load %arg17[%c0_41, %c0_42] : memref<32x1xf32, #tpu.memory_space<vmem>>, vector<32x1xf32>
      tpu.vector_store %arg17[%c0_41, %c0_42], %46 {strides = array<i32>} : memref<32x1xf32, #tpu.memory_space<vmem>>, vector<32x1xf32>,
      %cst_43 = arith.constant 0.000000e+00 : f32
      %48 = vector.broadcast %cst_43 : f32 to vector<32x128xf32>
      %c0_44 = arith.constant 0 : index
      %c0_45 = arith.constant 0 : index
      %49 = vector.load %arg18[%c0_44, %c0_45] : memref<32x128xf32, #tpu.memory_space<vmem>>, vector<32x128xf32>
      tpu.vector_store %arg18[%c0_44, %c0_45], %48 {strides = array<i32>} : memref<32x128xf32, #tpu.memory_space<vmem>>, vector<32x128xf32>,
    } else {
    }
    %c0 = arith.constant 0 : index
    %c0_1 = arith.constant 0 : index
    %3 = vector.load %arg15[%c0, %c0_1] : memref<32x128xf32, #tpu.memory_space<vmem>>, vector<32x128xf32>
    %c0_2 = arith.constant 0 : index
    %c0_3 = arith.constant 0 : index
    %c0_4 = arith.constant 0 : index
    %4 = vector.load %arg4[%c0_2, %c0_3, %c0_4] : memref<1x128x128xf32, #tpu.memory_space<vmem>>, vector<1x128x128xf32>
    %5 = vector.shape_cast %4 : vector<1x128x128xf32> to vector<128x128xf32>
    %cst = arith.constant dense<0.000000e+00> : vector<32x128xf32>
    %6 = tpu.matmul %3, %5, %cst {dimension_numbers = #tpu.dot_dimension_numbers<[1], [0], [0], [1], [0, 0, 1, 1], [], []>} : vector<32x128xf32>, vector<128x128xf32>, vector<32x128xf32> -> vector<32x128xf32>
    %c0_5 = arith.constant 0 : index
    %c0_6 = arith.constant 0 : index
    %7 = vector.load %arg16[%c0_5, %c0_6] : memref<32x1xf32, #tpu.memory_space<vmem>>, vector<32x1xf32>
    %cst_7 = arith.constant dense<0xFF800000> : vector<32xf32>
    %8 = vector.multi_reduction <maximumf>, %6, %cst_7 [1] : vector<32x128xf32> to vector<32xf32>
    %9 = vector.shape_cast %8 : vector<32xf32> to vector<32x1xf32>
    %10 = arith.maximumf %7, %9 : vector<32x1xf32>
    %11 = arith.subf %7, %10 : vector<32x1xf32>
    %12 = math.exp %11 : vector<32x1xf32>
    %13 = vector.broadcast %10 : vector<32x1xf32> to vector<32x128xf32>
    %14 = arith.subf %6, %13 : vector<32x128xf32>
    %15 = math.exp %14 : vector<32x128xf32>
    %c0_8 = arith.constant 0 : index
    %c0_9 = arith.constant 0 : index
    %c0_10 = arith.constant 0 : index
    %16 = vector.load %arg6[%c0_8, %c0_9, %c0_10] : memref<1x32x128xi8, #tpu.memory_space<vmem>>, vector<1x32x128xi8>
    %17 = vector.shape_cast %16 : vector<1x32x128xi8> to vector<32x128xi8>
    %18 = arith.sitofp %17 : vector<32x128xi8> to vector<32x128xf32>
    %19 = arith.mulf %15, %18 : vector<32x128xf32>
    %c0_11 = arith.constant 0 : index
    %c0_12 = arith.constant 0 : index
    %20 = vector.load %arg17[%c0_11, %c0_12] : memref<32x1xf32, #tpu.memory_space<vmem>>, vector<32x1xf32>
    %21 = arith.mulf %12, %20 : vector<32x1xf32>
    %cst_13 = arith.constant dense<0.000000e+00> : vector<32xf32>
    %22 = vector.multi_reduction <add>, %19, %cst_13 [1] : vector<32x128xf32> to vector<32xf32>
    %23 = vector.shape_cast %22 : vector<32xf32> to vector<32x1xf32>
    %24 = arith.addf %21, %23 : vector<32x1xf32>
    %c0_14 = arith.constant 0 : index
    %c0_15 = arith.constant 0 : index
    %25 = vector.load %arg17[%c0_14, %c0_15] : memref<32x1xf32, #tpu.memory_space<vmem>>, vector<32x1xf32>
    tpu.vector_store %arg17[%c0_14, %c0_15], %24 {strides = array<i32>} : memref<32x1xf32, #tpu.memory_space<vmem>>, vector<32x1xf32>,
    %c0_16 = arith.constant 0 : index
    %c0_17 = arith.constant 0 : index
    %26 = vector.load %arg18[%c0_16, %c0_17] : memref<32x128xf32, #tpu.memory_space<vmem>>, vector<32x128xf32>
    %27 = vector.broadcast %12 : vector<32x1xf32> to vector<32x128xf32>
    %28 = arith.mulf %27, %26 : vector<32x128xf32>
    %c0_18 = arith.constant 0 : index
    %c0_19 = arith.constant 0 : index
    %c0_20 = arith.constant 0 : index
    %29 = vector.load %arg5[%c0_18, %c0_19, %c0_20] : memref<1x128x128xf32, #tpu.memory_space<vmem>>, vector<1x128x128xf32>
    %30 = vector.shape_cast %29 : vector<1x128x128xf32> to vector<128x128xf32>
    %cst_21 = arith.constant dense<0.000000e+00> : vector<32x128xf32>
    %31 = tpu.matmul %19, %30, %cst_21 {dimension_numbers = #tpu.dot_dimension_numbers<[1], [0], [0], [1], [0, 0, 1, 1], [], []>} : vector<32x128xf32>, vector<128x128xf32>, vector<32x128xf32> -> vector<32x128xf32>
    %32 = arith.addf %28, %31 : vector<32x128xf32>
    %c0_22 = arith.constant 0 : index
    %c0_23 = arith.constant 0 : index
    %33 = vector.load %arg18[%c0_22, %c0_23] : memref<32x128xf32, #tpu.memory_space<vmem>>, vector<32x128xf32>
    tpu.vector_store %arg18[%c0_22, %c0_23], %32 {strides = array<i32>} : memref<32x128xf32, #tpu.memory_space<vmem>>, vector<32x128xf32>,
    %c0_24 = arith.constant 0 : index
    %c0_25 = arith.constant 0 : index
    %34 = vector.load %arg16[%c0_24, %c0_25] : memref<32x1xf32, #tpu.memory_space<vmem>>, vector<32x1xf32>
    tpu.vector_store %arg16[%c0_24, %c0_25], %10 {strides = array<i32>} : memref<32x1xf32, #tpu.memory_space<vmem>>, vector<32x1xf32>,
    %c0_i32_26 = arith.constant 0 : i32
    %35 = arith.cmpi eq, %arg2, %c0_i32_26 : i32
    %36 = arith.extui %35 : i1 to i32
    %c0_i32_27 = arith.constant 0 : i32
    %37 = arith.cmpi ne, %36, %c0_i32_27 : i32
    scf.if %37 {
      %c0_28 = arith.constant 0 : index
      %c0_29 = arith.constant 0 : index
      %38 = vector.load %arg17[%c0_28, %c0_29] : memref<32x1xf32, #tpu.memory_space<vmem>>, vector<32x1xf32>
      %c0_30 = arith.constant 0 : index
      %c0_31 = arith.constant 0 : index
      %39 = vector.load %arg16[%c0_30, %c0_31] : memref<32x1xf32, #tpu.memory_space<vmem>>, vector<32x1xf32>
      %cst_32 = arith.constant 0.000000e+00 : f32
      %40 = vector.broadcast %cst_32 : f32 to vector<32x1xf32>
      %41 = arith.subf %40, %39 : vector<32x1xf32>
      %42 = math.exp %41 : vector<32x1xf32>
      %cst_33 = arith.constant 9.99999997E-7 : f32
      %43 = vector.broadcast %cst_33 : f32 to vector<32x1xf32>
      %44 = arith.mulf %43, %42 : vector<32x1xf32>
      %45 = arith.addf %38, %44 : vector<32x1xf32>
      %c0_34 = arith.constant 0 : index
      %c0_35 = arith.constant 0 : index
      %46 = vector.load %arg18[%c0_34, %c0_35] : memref<32x128xf32, #tpu.memory_space<vmem>>, vector<32x128xf32>
      %47 = tpu.reciprocal %45 {approx = true} : vector<32x1xf32> -> vector<32x1xf32>
      %48 = vector.broadcast %47 : vector<32x1xf32> to vector<32x128xf32>
      %49 = arith.mulf %46, %48 : vector<32x128xf32>
      %c0_36 = arith.constant 0 : index
      %c0_37 = arith.constant 0 : index
      %c0_38 = arith.constant 0 : index
      %50 = vector.load %arg3[%c0_36, %c0_37, %c0_38] : memref<1x32x128xf32, #tpu.memory_space<vmem>>, vector<1x32x128xf32>
      %51 = vector.shape_cast %50 : vector<1x32x128xf32> to vector<32x128xf32>
      %52 = arith.addf %51, %49 : vector<32x128xf32>
      %cst_39 = arith.constant dense<0.000000e+00> : vector<32xf32>
      %53 = vector.multi_reduction <add>, %52, %cst_39 [1] : vector<32x128xf32> to vector<32xf32>
      %54 = vector.shape_cast %53 : vector<32xf32> to vector<32x1xf32>
      %cst_40 = arith.constant 3.125000e-02 : f32
      %55 = vector.broadcast %cst_40 : f32 to vector<32x1xf32>
      %56 = arith.mulf %54, %55 : vector<32x1xf32>
      %57 = arith.mulf %52, %52 : vector<32x128xf32>
      %cst_41 = arith.constant dense<0.000000e+00> : vector<32xf32>
      %58 = vector.multi_reduction <add>, %57, %cst_41 [1] : vector<32x128xf32> to vector<32xf32>
      %59 = vector.shape_cast %58 : vector<32xf32> to vector<32x1xf32>
      %cst_42 = arith.constant 3.125000e-02 : f32
      %60 = vector.broadcast %cst_42 : f32 to vector<32x1xf32>
      %61 = arith.mulf %59, %60 : vector<32x1xf32>
      %62 = arith.mulf %56, %56 : vector<32x1xf32>
      %63 = arith.subf %61, %62 : vector<32x1xf32>
      %64 = vector.broadcast %56 : vector<32x1xf32> to vector<32x128xf32>
      %65 = arith.subf %52, %64 : vector<32x128xf32>
      %cst_43 = arith.constant 9.99999974E-6 : f32
      %66 = vector.broadcast %cst_43 : f32 to vector<32x1xf32>
      %67 = arith.addf %63, %66 : vector<32x1xf32>
      %68 = math.rsqrt %67 : vector<32x1xf32>
      %69 = vector.broadcast %68 : vector<32x1xf32> to vector<32x128xf32>
      %70 = arith.mulf %65, %69 : vector<32x128xf32>
      %c0_44 = arith.constant 0 : index
      %c0_45 = arith.constant 0 : index
      %c0_46 = arith.constant 0 : index
      %71 = vector.load %arg10[%c0_44, %c0_45, %c0_46] : memref<1x1x128xf32, #tpu.memory_space<vmem>>, vector<1x1x128xf32>
      %72 = vector.shape_cast %71 : vector<1x1x128xf32> to vector<1x128xf32>
      %73 = vector.broadcast %72 : vector<1x128xf32> to vector<32x128xf32>
      %74 = arith.mulf %70, %73 : vector<32x128xf32>
      %c0_47 = arith.constant 0 : index
      %c0_48 = arith.constant 0 : index
      %c0_49 = arith.constant 0 : index
      %75 = vector.load %arg11[%c0_47, %c0_48, %c0_49] : memref<1x1x128xf32, #tpu.memory_space<vmem>>, vector<1x1x128xf32>
      %76 = vector.shape_cast %75 : vector<1x1x128xf32> to vector<1x128xf32>
      %77 = vector.broadcast %76 : vector<1x128xf32> to vector<32x128xf32>
      %78 = arith.addf %74, %77 : vector<32x128xf32>
      %c0_50 = arith.constant 0 : index
      %c0_51 = arith.constant 0 : index
      %c0_52 = arith.constant 0 : index
      %79 = vector.load %arg8[%c0_50, %c0_51, %c0_52] : memref<1x128x128xf32, #tpu.memory_space<vmem>>, vector<1x128x128xf32>
      %80 = vector.shape_cast %79 : vector<1x128x128xf32> to vector<128x128xf32>
      %cst_53 = arith.constant dense<0.000000e+00> : vector<32x128xf32>
      %81 = tpu.matmul %78, %80, %cst_53 {dimension_numbers = #tpu.dot_dimension_numbers<[1], [0], [0], [1], [0, 0, 1, 1], [], []>} : vector<32x128xf32>, vector<128x128xf32>, vector<32x128xf32> -> vector<32x128xf32>
      %cst_54 = arith.constant 0.000000e+00 : f32
      %82 = vector.broadcast %cst_54 : f32 to vector<32x128xf32>
      %83 = arith.maximumf %81, %82 : vector<32x128xf32>
      %c0_55 = arith.constant 0 : index
      %c0_56 = arith.constant 0 : index
      %c0_57 = arith.constant 0 : index
      %84 = vector.load %arg9[%c0_55, %c0_56, %c0_57] : memref<1x128x128xf32, #tpu.memory_space<vmem>>, vector<1x128x128xf32>
      %85 = vector.shape_cast %84 : vector<1x128x128xf32> to vector<128x128xf32>
      %cst_58 = arith.constant dense<0.000000e+00> : vector<32x128xf32>
      %86 = tpu.matmul %83, %85, %cst_58 {dimension_numbers = #tpu.dot_dimension_numbers<[1], [0], [0], [1], [0, 0, 1, 1], [], []>} : vector<32x128xf32>, vector<128x128xf32>, vector<32x128xf32> -> vector<32x128xf32>
      %87 = arith.addf %78, %86 : vector<32x128xf32>
      %cst_59 = arith.constant dense<0.000000e+00> : vector<32xf32>
      %88 = vector.multi_reduction <add>, %87, %cst_59 [1] : vector<32x128xf32> to vector<32xf32>
      %89 = vector.shape_cast %88 : vector<32xf32> to vector<32x1xf32>
      %cst_60 = arith.constant 3.125000e-02 : f32
      %90 = vector.broadcast %cst_60 : f32 to vector<32x1xf32>
      %91 = arith.mulf %89, %90 : vector<32x1xf32>
      %92 = arith.mulf %87, %87 : vector<32x128xf32>
      %cst_61 = arith.constant dense<0.000000e+00> : vector<32xf32>
      %93 = vector.multi_reduction <add>, %92, %cst_61 [1] : vector<32x128xf32> to vector<32xf32>
      %94 = vector.shape_cast %93 : vector<32xf32> to vector<32x1xf32>
      %cst_62 = arith.constant 3.125000e-02 : f32
      %95 = vector.broadcast %cst_62 : f32 to vector<32x1xf32>
      %96 = arith.mulf %94, %95 : vector<32x1xf32>
      %97 = arith.mulf %91, %91 : vector<32x1xf32>
      %98 = arith.subf %96, %97 : vector<32x1xf32>
      %99 = vector.broadcast %91 : vector<32x1xf32> to vector<32x128xf32>
      %100 = arith.subf %87, %99 : vector<32x128xf32>
      %cst_63 = arith.constant 9.99999974E-6 : f32
      %101 = vector.broadcast %cst_63 : f32 to vector<32x1xf32>
      %102 = arith.addf %98, %101 : vector<32x1xf32>
      %103 = math.rsqrt %102 : vector<32x1xf32>
      %104 = vector.broadcast %103 : vector<32x1xf32> to vector<32x128xf32>
      %105 = arith.mulf %100, %104 : vector<32x128xf32>
      %c0_64 = arith.constant 0 : index
      %c0_65 = arith.constant 0 : index
      %c0_66 = arith.constant 0 : index
      %106 = vector.load %arg12[%c0_64, %c0_65, %c0_66] : memref<1x1x128xf32, #tpu.memory_space<vmem>>, vector<1x1x128xf32>
      %107 = vector.shape_cast %106 : vector<1x1x128xf32> to vector<1x128xf32>
      %108 = vector.broadcast %107 : vector<1x128xf32> to vector<32x128xf32>
      %109 = arith.mulf %105, %108 : vector<32x128xf32>
      %c0_67 = arith.constant 0 : index
      %c0_68 = arith.constant 0 : index
      %c0_69 = arith.constant 0 : index
      %110 = vector.load %arg13[%c0_67, %c0_68, %c0_69] : memref<1x1x128xf32, #tpu.memory_space<vmem>>, vector<1x1x128xf32>
      %111 = vector.shape_cast %110 : vector<1x1x128xf32> to vector<1x128xf32>
      %112 = vector.broadcast %111 : vector<1x128xf32> to vector<32x128xf32>
      %113 = arith.addf %109, %112 : vector<32x128xf32>
      %c0_70 = arith.constant 0 : index
      %c0_71 = arith.constant 0 : index
      %c0_72 = arith.constant 0 : index
      %114 = vector.load %arg14[%c0_70, %c0_71, %c0_72] : memref<1x32x128xf32, #tpu.memory_space<vmem>>, vector<1x32x128xf32>
      %115 = vector.shape_cast %114 : vector<1x32x128xf32> to vector<32x128xf32>
      %116 = vector.shape_cast %113 : vector<32x128xf32> to vector<1x32x128xf32>
      tpu.vector_store %arg14[%c0_70, %c0_71, %c0_72], %116 {strides = array<i32>} : memref<1x32x128xf32, #tpu.memory_space<vmem>>, vector<1x32x128xf32>,
    } else {
    }
    return
  }
  func.func @transform_0(%arg0: i32, %arg1: i32, %arg2: i32) -> (i32, i32, i32) {
    %c0_i32 = arith.constant 0 : i32
    %c0_i32_0 = arith.constant 0 : i32
    return %arg0, %arg1, %c0_i32 : i32, i32, i32
  }
  func.func @transform_1(%arg0: i32, %arg1: i32, %arg2: i32) -> (i32, i32, i32) {
    %c0_i32 = arith.constant 0 : i32
    %c0_i32_0 = arith.constant 0 : i32
    return %arg0, %c0_i32, %arg2 : i32, i32, i32
  }
  func.func @transform_2(%arg0: i32, %arg1: i32, %arg2: i32) -> (i32, i32, i32) {
    %c0_i32 = arith.constant 0 : i32
    %c0_i32_0 = arith.constant 0 : i32
    return %arg0, %arg2, %c0_i32 : i32, i32, i32
  }
  func.func @transform_3(%arg0: i32, %arg1: i32, %arg2: i32) -> (i32, i32, i32) {
    %c0_i32 = arith.constant 0 : i32
    return %arg0, %arg1, %arg2 : i32, i32, i32
  }
  func.func @transform_4(%arg0: i32, %arg1: i32, %arg2: i32) -> (i32, i32, i32) {
    %c0_i32 = arith.constant 0 : i32
    %c0_i32_0 = arith.constant 0 : i32
    %c0_i32_1 = arith.constant 0 : i32
    return %arg0, %c0_i32, %c0_i32_0 : i32, i32, i32
  }
  func.func @transform_5(%arg0: i32, %arg1: i32, %arg2: i32) -> (i32, i32, i32) {
    %c0_i32 = arith.constant 0 : i32
    %c0_i32_0 = arith.constant 0 : i32
    %c0_i32_1 = arith.constant 0 : i32
    return %arg0, %c0_i32, %c0_i32_0 : i32, i32, i32
  }
  func.func @transform_6(%arg0: i32, %arg1: i32, %arg2: i32) -> (i32, i32, i32) {
    %c0_i32 = arith.constant 0 : i32
    %c0_i32_0 = arith.constant 0 : i32
    %c0_i32_1 = arith.constant 0 : i32
    return %arg0, %c0_i32, %c0_i32_0 : i32, i32, i32
  }
  func.func @transform_7(%arg0: i32, %arg1: i32, %arg2: i32) -> (i32, i32, i32) {
    %c0_i32 = arith.constant 0 : i32
    %c0_i32_0 = arith.constant 0 : i32
    %c0_i32_1 = arith.constant 0 : i32
    return %arg0, %c0_i32, %c0_i32_0 : i32, i32, i32
  }
  func.func @transform_8(%arg0: i32, %arg1: i32, %arg2: i32) -> (i32, i32, i32) {
    %c0_i32 = arith.constant 0 : i32
    %c0_i32_0 = arith.constant 0 : i32
    %c0_i32_1 = arith.constant 0 : i32
    return %arg0, %c0_i32, %c0_i32_0 : i32, i32, i32
  }
  func.func @transform_9(%arg0: i32, %arg1: i32, %arg2: i32) -> (i32, i32, i32) {
    %c0_i32 = arith.constant 0 : i32
    %c0_i32_0 = arith.constant 0 : i32
    %c0_i32_1 = arith.constant 0 : i32
    return %arg0, %c0_i32, %c0_i32_0 : i32, i32, i32
  }
  func.func @transform_10(%arg0: i32, %arg1: i32, %arg2: i32) -> (i32, i32, i32) {
    %c0_i32 = arith.constant 0 : i32
    %c0_i32_0 = arith.constant 0 : i32
    %c0_i32_1 = arith.constant 0 : i32
    return %arg0, %c0_i32, %c0_i32_0 : i32, i32, i32
  }
  func.func @transform_11(%arg0: i32, %arg1: i32, %arg2: i32) -> (i32, i32, i32) {
    %c0_i32 = arith.constant 0 : i32
    %c0_i32_0 = arith.constant 0 : i32
    return %arg0, %arg1, %c0_i32 : i32, i32, i32
  }
}

</mosaic_0001>

<bundles_post_ra>
// kernel: tpu_custom_call.1
= control target key start
LH: loop header
LB: loop body
LE: loop exit
PB: predicated region body
PF: predicated region fallthrough
CT: control target
= control target key end

     0   :  { %s3432_s0 = inlined_call_operand.hbm [shape: f32[2,32,128], index: 0, kind: input, shape index: {}]   ;;  %s3433_s1 = inlined_call_operand.hbm [shape: f32[2,128,128], index: 1, kind: input, shape index: {}]   ;;  %s3434_s2 = inlined_call_operand.hbm [shape: f32[2,128,128], index: 2, kind: input, shape index: {}]   ;;  %s3435_s3 = inlined_call_operand.hbm [shape: s8[2,32,128], index: 3, kind: input, shape index: {}]   ;;  %s3436_s4 = inlined_call_operand.hbm [shape: f32[2,128,128], index: 4, kind: input, shape index: {}]   ;;  %s3437_s5 = inlined_call_operand.hbm [shape: f32[2,128,128], index: 5, kind: input, shape index: {}]   ;;  %s3438_s6 = inlined_call_operand.hbm [shape: f32[2,128,128], index: 6, kind: input, shape index: {}]   ;;  %s3439_s7 = inlined_call_operand.vmem [shape: f32[2,1,128], index: 7, kind: input, shape index: {}]   ;;  %s3440_s8 = inlined_call_operand.vmem [shape: f32[2,1,128], index: 8, kind: input, shape index: {}]   ;;  %s3441_s9 = inlined_call_operand.vmem [shape: f32[2,1,128], index: 9, kind: input, shape index: {}]   ;;  %s3442_s10 = inlined_call_operand.vmem [shape: f32[2,1,128], index: 10, kind: input, shape index: {}]   ;;  %s3443_s11 = inlined_call_operand.hbm [shape: f32[2,32,128], index: 11, kind: output, shape index: {}]  }
   0x1   :  { %3460 = sst [smem:[#allocation33_spill]] %s3433_s1 }
   0x2   :  { %3461 = sst [smem:[#allocation34_spill]] %s3435_s3 }
   0x3   :  { %3462 = sst [smem:[#allocation35_spill]] %s3437_s5 }
   0x4   :  { %3463 = sst [smem:[#allocation36_spill]] %s3439_s7 }
   0x5   :  { %3464 = sst [smem:[#allocation37_spill]] %s3440_s8 }
   0x6   :  { %3465 = sst [smem:[#allocation38_spill]] %s3441_s9 }
   0x7   :  { %3466 = sst [smem:[#allocation39_spill]] %s3442_s10 }
   0x8   :  { %3467 = sst [smem:[#allocation40_spill]] %s3443_s11 }
   0x9   :  { %16 = vsyncpa [#allocation7], 0 }
   0xa   :  { %18 = vsyncpa [#allocation7 + $0x1], 0 }
   0xb   :  { %19 = vsyncpa [#allocation10], 0 }
   0xc   :  { %21 = vsyncpa [#allocation10 + $0x1], 0 }
   0xd   :  { %22 = vsyncpa [#allocation13], 0 }
   0xe   :  { %24 = vsyncpa [#allocation13 + $0x1], 0 }
   0xf   :  { %25 = vsyncpa [#allocation16], 0 }
  0x10   :  { %27 = vsyncpa [#allocation16 + $0x1], 0 }
  0x11   :  { %28 = vsyncpa [#allocation8], 0 }
  0x12   :  { %30 = vsyncpa [#allocation8 + $0x1], 0  ;;  %s2796_s17 = smov 0   ;;  %s2798_s18 = smov 0  }
  0x13   :  { %s2800_s19 = smov 0   ;;  %s2802_s20 = smov 0  }
  0x14   :  { %s2804_s21 = smov 0   ;;  %s2806_s22 = smov 0  }
  0x15 LB: > { %3468 = sst [smem:[#allocation24_spill]] %s2699_s17  ;;  %s2827_s23 = sadd.s32 4294967295, %s2719_s22   ;;  %s2719_s22 = sphi %s2806_s22, %s36_s22   ;;  %s2715_s21 = sphi %s2804_s21, %s3508_s21   ;;  %s2711_s20 = sphi %s2802_s20, %s3507_s20   ;;  %s2707_s19 = sphi %s2800_s19, %s3503_s19   ;;  %s2703_s18 = sphi %s2798_s18, %s3506_s18   ;;  %s2699_s17 = sphi %s2796_s17, %s3505_s17  }
  0x16   : > { %3469 = sst [smem:[#allocation25_spill]] %s2707_s19  ;;  %s1912_s24 = sadd.s32 4294967294, %s2719_s22  }
  0x17   : > { %3470 = sst [smem:[#allocation26_spill]] %s2711_s20  ;;  %s55_s25 = sadd.s32 1, %s2715_s21 }
  0x18   : > { %3471 = sst [smem:[#allocation27_spill]] %s2719_s22  ;;  %s64_s26 = sadd.s32 1, %s2707_s19 }
  0x19   : > { %3472 = sst [smem:[#allocation28_spill]] %s2827_s23  ;;  %p57_p0 = scmp.ge.s32.totalorder %s55_s25, 2 }
  0x1a   : > { %p71_p1 = scmp.ne.s32.totalorder %s2707_s19, %s2703_s18  ;;  %p72_p2 = scmp.eq.s32.totalorder %s2719_s22, 0 }
  0x1b   : > { %p77_p3 = scmp.ne.s32.totalorder %s2703_s18, %s2699_s17  ;;  %s3510_s25 = smov (%p57_p0, %s55_s25), 0 }
  0x1c   : > { %3473 = sst [smem:[#allocation29_spill]] %s3510_s25  ;;  %p2839_p4 = por %p72_p2, %p71_p1 }
  0x1d   : > { %p78_p5 = scmp.eq.s32.totalorder %s2827_s23, 0  ;;  %s59_s28 = ssub.s32 %s2715_s21, %s3510_s25 }
  0x1e   : > { %p371_p6 = scmp.eq.s32.totalorder %s2827_s23, 1  ;;  %p62_p7 = scmp.eq.s32.totalorder %s59_s28, 0 }
  0x1f   : > { %p2847_p8 = por %p78_p5, %p77_p3  ;;  %p377_p10 = scmp.eq.s32.totalorder %s1912_s24, 1 }
  0x20   : > { %p2851_p9 = por %p371_p6, %p71_p1  ;;  %p1914_p12 = scmp.ge.s32.totalorder %s2719_s22, 2 }
  0x21   : > { %s2856_s12 = scalar_select %p62_p7, %s2707_s19, %s64_s26  }
  0x22   : > { %s3476_s30 = scalar_select %p2851_p9, 1, 0 }
  0x23   : > { %3478 = sst [smem:[#allocation31_spill]] %s2856_s12  ;;  %p2858_p11 = por %p377_p10, %p77_p3 }
  0x24   : > { %3477 = sst [smem:[#allocation30_spill]] %s3476_s30  ;;  %p2324_p13 = scmp.lt.s32.totalorder %s2719_s22, 2 }
  0x25   : > { %s3479_s13 = scalar_select %p2858_p11, 1, 0 }
  0x26   : > { %s2865_s14 = sand.u32 1, %s2707_s19   ;;  %p2869_p0 = pnand %p2324_p13, %p2839_p4 }
  0x27   : > { %3480 = sst [smem:[#allocation32_spill]] %s3479_s13  ;;  %s2874_s16 = sand.u32 1, %s2719_s22  }
  0x28   : > { %s2877_s24 = sshll.u32 %s2865_s14, 7  ;;  %s2880_s26 = sshll.u32 %s2715_s21, 11 }
  0x29   : > { %s424_s28 = scalar_lea.vmem [#allocation9], %s2877_s24  ;;  %s3482_s1 = sld [smem:[#allocation33_spill]] }
  0x2a   : > { %s432_s25 = sshll.u32 %s424_s28, 4  ;;  %s3453_s13 = scalar_lea.sflag [#allocation10], %s2874_s16  ;;  %s433_s25 = int_to_ptr.vmem [resolvable:$true] %s432_s25 }
  0x2b   : > { %p2890_p1 = pneg %p2869_p0  ;;  %s2444_s11 = scalar_lea.vmem %s433_s25, 2048 }
  0x2c   : > { %p2445_p2 = scmp.ne.s32.totalorder %s433_s25, %s2444_s11  ;;  %s2721_s30 = smov [#allocation9]  }
  0x2d   : > { %s2449_s10 = sshll.u32 %s2721_s30, 4  ;;  %s2450_s10 = int_to_ptr.vmem [resolvable:$false] %s2449_s10 }
  0x2e   : > { %p2447_p3 = pnand %p2445_p2, %p2890_p1  ;;  %s2451_s28 = scalar_lea.vmem %s2450_s10, 4096 }
  0x2f   : > { %s431_s27 = scalar_lea.hbm %s3482_s1, %s2880_s26  ;;  %p2452_p5 = scmp.lt.s32.totalorder %s433_s25, %s2450_s10 }
  0x30   : > { %p2448_p4 = pneg %p2447_p3  ;;  %p2453_p6 = scmp.lt.s32.totalorder %s2451_s28, %s2444_s11 }
  0x32   : > { %p2454_p7 = por %p2453_p6, %p2452_p5 }
  0x34   : > { %p2455_p10 = pnand %p2454_p7, %p2448_p4 }
  0x36   : > { %2458 = shalt.err (!%p2455_p10)
}
  0x37   : > { %s3454_s19 = smov 128   ;;  %s2723_s12 = smov 8  }
  0x38   : > { %2304 = dma.hbm_to_vmem [thread:$0]  (!%p2869_p0), %s431_s27, 2048, %s433_s25, %s3453_s13, %s3454_s19, %s3454_s19, %s2723_s12  }
  0x39   : > { %p1935_p13 = scmp.ge.s32.totalorder %s2719_s22, 1  ;;  %p570_p2 = scmp.lt.s32.totalorder %s2719_s22, 3 }
  0x3a   : > { %s1924_s10 = sshll.u32 %s2865_s14, 3  ;;  %s1925_s30 = sshll.u32 %s2715_s21, 7 }
  0x3b   : > { %p2906_p3 = pnand %p1935_p13, %p570_p2  ;;  %s469_s28 = scalar_lea.vmem [#allocation12], %s1924_s10 }
  0x3c   : > { %s478_s1 = sshll.u32 %s469_s28, 4  ;;  %s3485_s3 = sld [smem:[#allocation34_spill]]  ;;  %s479_s1 = int_to_ptr.vmem [resolvable:$true] %s478_s1 }
  0x3d   : > { %s3456_s20 = scalar_lea.sflag [#allocation13], %s2874_s16  ;;  %s2472_s23 = scalar_lea.vmem %s479_s1, 128 }
  0x3e   : > { %p2473_p4 = scmp.ne.s32.totalorder %s479_s1, %s2472_s23  ;;  %s2724_s25 = smov [#allocation12]  }
  0x3f   : > { %s2477_s27 = sshll.u32 %s2724_s25, 4  ;;  %s2478_s27 = int_to_ptr.vmem [resolvable:$false] %s2477_s27 }
  0x40   : > { %p2475_p5 = pnand %p2473_p4, %p2890_p1  ;;  %s2479_s13 = scalar_lea.vmem %s2478_s27, 256 }
  0x41   : > { %p2480_p7 = scmp.lt.s32.totalorder %s479_s1, %s2478_s27  ;;  %p2481_p10 = scmp.lt.s32.totalorder %s2479_s13, %s2472_s23 }
  0x42   : > { %s476_s7 = scalar_lea.hbm %s3485_s3, %s1925_s30  ;;  %p2476_p6 = pneg %p2475_p5 }
  0x43   : > { %p2482_p13 = por %p2481_p10, %p2480_p7 }
  0x45   : > { %p2483_p2 = pnand %p2482_p13, %p2476_p6 }
  0x47   : > { %2486 = shalt.err (!%p2483_p2)
}
  0x48   : > { %2310 = dma.hbm_to_vmem [thread:$0]  (!%p2869_p0), %s476_s7, 128, %s479_s1, %s3456_s20  }
  0x49   : > { %s3486_s5 = sld [smem:[#allocation35_spill]]  ;;  %s510_s30 = scalar_lea.vmem [#allocation15], %s2877_s24 }
  0x4a   : > { %s517_s28 = sshll.u32 %s510_s30, 4  ;;  %s3459_s23 = scalar_lea.sflag [#allocation16], %s2874_s16  ;;  %s518_s28 = int_to_ptr.vmem [resolvable:$true] %s517_s28 }
  0x4b   : > { %s2500_s13 = scalar_lea.vmem %s518_s28, 2048  ;;  %s2725_s25 = smov [#allocation15]  }
  0x4c   : > { %p2501_p4 = scmp.ne.s32.totalorder %s518_s28, %s2500_s13  ;;  %s2505_s27 = sshll.u32 %s2725_s25, 4  ;;  %s2506_s27 = int_to_ptr.vmem [resolvable:$false] %s2505_s27 }
  0x4d   : > { %s2507_s19 = scalar_lea.vmem %s2506_s27, 4096  ;;  %p2508_p7 = scmp.lt.s32.totalorder %s518_s28, %s2506_s27 }
  0x4e   : > { %p2503_p5 = pnand %p2501_p4, %p2890_p1  ;;  %p2509_p10 = scmp.lt.s32.totalorder %s2507_s19, %s2500_s13 }
  0x4f   : > { %s516_s10 = scalar_lea.hbm %s3486_s5, %s2880_s26 }
  0x50   : > { %p2504_p6 = pneg %p2503_p5  ;;  %p2510_p13 = por %p2509_p10, %p2508_p7 }
  0x52   : > { %p2511_p2 = pnand %p2510_p13, %p2504_p6 }
  0x54   : > { %2514 = shalt.err (!%p2511_p2)
}
  0x55   : > { %s3487_s1 = smov 128   ;;  %s1915_s7 = sshll.u32 %s2865_s14, 5 }
  0x56   : > { %2316 = dma.hbm_to_vmem [thread:$0]  (!%p2869_p0), %s516_s10, 2048, %s518_s28, %s3459_s23, %s3487_s1, %s3487_s1, %s2723_s12  }
  0x57   : > { %s1953_s8 = sshll.u32 %s2715_s21, 9  ;;  %s401_s13 = scalar_lea.vmem [#allocation6], %s1915_s7 }
  0x58   : > { %s409_s30 = scalar_lea.hbm %s3432_s0, %s1953_s8  ;;  %s410_s25 = sshll.u32 %s401_s13, 4  ;;  %s411_s25 = int_to_ptr.vmem [resolvable:$true] %s410_s25 }
  0x59   : > { %s454_s3 = scalar_lea.hbm %s3434_s2, %s2880_s26  ;;  %s398_s5 = scalar_lea.sflag [#allocation7], %s2865_s14 }
  0x5a   : > { %s2528_s22 = scalar_lea.vmem %s411_s25, 512  ;;  %s2726_s10 = smov [#allocation6]  }
  0x5b   : > { %p2529_p4 = scmp.ne.s32.totalorder %s411_s25, %s2528_s22  ;;  %s2533_s28 = sshll.u32 %s2726_s10, 4  ;;  %s2534_s28 = int_to_ptr.vmem [resolvable:$false] %s2533_s28 }
  0x5c   : > { %s2535_s23 = scalar_lea.vmem %s2534_s28, 1024  ;;  %p2536_p7 = scmp.lt.s32.totalorder %s411_s25, %s2534_s28 }
  0x5d   : > { %p2531_p5 = pnand %p2529_p4, %p2890_p1  ;;  %p2537_p10 = scmp.lt.s32.totalorder %s2535_s23, %s2528_s22 }
  0x5f   : > { %p2532_p6 = pneg %p2531_p5  ;;  %p2538_p13 = por %p2537_p10, %p2536_p7 }
  0x61   : > { %p2539_p2 = pnand %p2538_p13, %p2532_p6 }
  0x63   : > { %2542 = shalt.err (!%p2539_p2)
}
  0x64   : > { %2301 = dma.hbm_to_vmem [thread:$0]  (!%p2869_p0), %s409_s30, 512, %s411_s25, %s398_s5, %s3487_s1, %s3487_s1, %s2723_s12  }
  0x65   : > { %s446_s20 = scalar_lea.vmem [#allocation11], %s2877_s24  ;;  %s495_s9 = scalar_lea.hbm %s3436_s4, %s2880_s26 }
  0x66   : > { %s455_s14 = sshll.u32 %s446_s20, 4  ;;  %s2727_s23 = smov [#allocation11]   ;;  %s456_s14 = int_to_ptr.vmem [resolvable:$true] %s455_s14 }
  0x67   : > { %s2556_s22 = scalar_lea.vmem %s456_s14, 2048  ;;  %s2561_s19 = sshll.u32 %s2727_s23, 4  ;;  %s2562_s19 = int_to_ptr.vmem [resolvable:$false] %s2561_s19 }
  0x68   : > { %p2557_p4 = scmp.ne.s32.totalorder %s456_s14, %s2556_s22  ;;  %s2563_s13 = scalar_lea.vmem %s2562_s19, 4096 }
  0x69   : > { %p2564_p7 = scmp.lt.s32.totalorder %s456_s14, %s2562_s19  ;;  %p2565_p10 = scmp.lt.s32.totalorder %s2563_s13, %s2556_s22 }
  0x6a   : > { %p2559_p5 = pnand %p2557_p4, %p2890_p1 }
  0x6b   : > { %p2566_p13 = por %p2565_p10, %p2564_p7 }
  0x6c   : > { %p2560_p6 = pneg %p2559_p5 }
  0x6e   : > { %p2567_p2 = pnand %p2566_p13, %p2560_p6 }
  0x70   : > { %2570 = shalt.err (!%p2567_p2)
}
  0x71   : > { %s3488_s5 = scalar_lea.sflag [#allocation10], %s2874_s16  ;;  %s489_s27 = scalar_lea.vmem [#allocation14], %s2877_s24 }
  0x72   : > { %2307 = dma.hbm_to_vmem [thread:$0]  (!%p2869_p0), %s454_s3, 2048, %s456_s14, %s3488_s5, %s3487_s1, %s3487_s1, %s2723_s12  }
  0x73   : > { %s496_s10 = sshll.u32 %s489_s27, 4  ;;  %s537_s7 = scalar_lea.hbm %s3438_s6, %s2880_s26  ;;  %s497_s10 = int_to_ptr.vmem [resolvable:$true] %s496_s10 }
  0x74   : > { %s2584_s8 = scalar_lea.vmem %s497_s10, 2048  ;;  %s2728_s22 = smov [#allocation14]  }
  0x75   : > { %p2585_p4 = scmp.ne.s32.totalorder %s497_s10, %s2584_s8  ;;  %s2589_s23 = sshll.u32 %s2728_s22, 4  ;;  %s2590_s23 = int_to_ptr.vmem [resolvable:$false] %s2589_s23 }
  0x76   : > { %s2591_s19 = scalar_lea.vmem %s2590_s23, 4096  ;;  %p2592_p7 = scmp.lt.s32.totalorder %s497_s10, %s2590_s23 }
  0x77   : > { %p2587_p5 = pnand %p2585_p4, %p2890_p1  ;;  %p2593_p10 = scmp.lt.s32.totalorder %s2591_s19, %s2584_s8 }
  0x79   : > { %p2588_p6 = pneg %p2587_p5  ;;  %p2594_p13 = por %p2593_p10, %p2592_p7 }
  0x7b   : > { %p2595_p2 = pnand %p2594_p13, %p2588_p6 }
  0x7d   : > { %2598 = shalt.err (!%p2595_p2)
}
  0x7e   : > { %s3489_s3 = scalar_lea.sflag [#allocation13], %s2874_s16  ;;  %s531_s5 = scalar_lea.vmem [#allocation17], %s2877_s24 }
  0x7f   : > { %2313 = dma.hbm_to_vmem [thread:$0]  (!%p2869_p0), %s495_s9, 2048, %s497_s10, %s3489_s3, %s3487_s1, %s3487_s1, %s2723_s12  }
  0x80   : > { %s538_s30 = sshll.u32 %s531_s5, 4  ;;  %s2729_s27 = smov [#allocation17]   ;;  %s539_s30 = int_to_ptr.vmem [resolvable:$true] %s538_s30 }
  0x81   : > { %s2612_s25 = scalar_lea.vmem %s539_s30, 2048  ;;  %s2617_s28 = sshll.u32 %s2729_s27, 4  ;;  %s2618_s28 = int_to_ptr.vmem [resolvable:$false] %s2617_s28 }
  0x82   : > { %p2613_p4 = scmp.ne.s32.totalorder %s539_s30, %s2612_s25  ;;  %s2619_s20 = scalar_lea.vmem %s2618_s28, 4096 }
  0x83   : > { %p2620_p7 = scmp.lt.s32.totalorder %s539_s30, %s2618_s28  ;;  %p2621_p10 = scmp.lt.s32.totalorder %s2619_s20, %s2612_s25 }
  0x84   : > { %p2615_p5 = pnand %p2613_p4, %p2890_p1 }
  0x85   : > { %p2622_p13 = por %p2621_p10, %p2620_p7 }
  0x86   : > { %p2616_p6 = pneg %p2615_p5 }
  0x88   : > { %p2623_p2 = pnand %p2622_p13, %p2616_p6 }
  0x8a   : > { %2626 = shalt.err (!%p2623_p2)
}
  0x8b   : > { %s3490_s24 = scalar_lea.sflag [#allocation16], %s2874_s16  ;;  %574 = sbr.rel (%p2906_p3) target bundleno = 1918 (0x77e), region = 64 }
  0x8c   : > { %2319 = dma.hbm_to_vmem [thread:$0]  (!%p2869_p0), %s537_s7, 2048, %s539_s30, %s3490_s24, %s3487_s1, %s3487_s1, %s2723_s12  }
  0x8d   : > { %s3009_s10 = sand.u32 (!%p2906_p3), 1, %s2703_s18  }
  0x8e   : > { %s1936_s15 = sshll.u32 (!%p2906_p3), %s3009_s10, 5  ;;  %s577_s8 = scalar_lea.sflag (!%p2906_p3), [#allocation7], %s3009_s10 }
  0x8f   : > { %s3015_s16 = scalar_lea.vmem (!%p2906_p3), [#allocation6], %s1936_s15 }
  0x90   : > { %2678 = dma.done.wait (%p2847_p8), %s577_s8, 512  }
  0x91   : > { %2680 = vsyncadd (%p2847_p8), %s577_s8, 4294966784  ;;  %s3491_s26 = sld [smem:[#allocation28_spill]]  ;;  %s3023_s11 = sshll.u32 %s3009_s10, 7 }
  0x92   : > { %s3026_s7 = scalar_lea.vmem [#allocation9], %s3023_s11 }
  0x97   : > { %s585_s12 = sand.u32 1, %s3491_s26  }
  0x98   : > { %s586_s1 = scalar_lea.sflag [#allocation10], %s585_s12 }
  0x99   : > { %2682 = dma.done.wait (%p2847_p8), %s586_s1, 4096  }
  0x9a   : > { %2684 = vsyncadd (%p2847_p8), %s586_s1, 4294963200  ;;  %s1939_s22 = sshll.u32 %s3009_s10, 3  ;;  %s3034_s23 = scalar_lea.vmem [#allocation11], %s3023_s11 }
  0x9b   : > { %s604_s19 = scalar_lea.sflag [#allocation13], %s585_s12  ;;  %s3036_s3 = scalar_lea.vmem [#allocation12], %s1939_s22 }
  0x9c   : > { %2686 = dma.done.wait (%p2847_p8), %s604_s19, 2176  }
  0x9d   : > { %2688 = vsyncadd (%p2847_p8), %s604_s19, 4294965120  ;;  %s3043_s14 = scalar_lea.vmem [#allocation14], %s3023_s11  ;;  %s622_s13 = scalar_lea.sflag [#allocation16], %s585_s12 }
  0x9e   : > { %s3046_s5 = scalar_lea.vmem [#allocation15], %s3023_s11 }
  0x9f   : > { %2690 = dma.done.wait (%p2847_p8), %s622_s13, 4096  }
  0xa0   : > { %2692 = vsyncadd (%p2847_p8), %s622_s13, 4294963200  ;;  %v753_v0 = vld [vmem:[%s3043_s14 + $0x78] sm:$0xff]  ;;  %v752_v1 = vld [vmem:[%s3043_s14 + $0x70] sm:$0xff]  ;;  %vm843_vm0 = vcmask 7168   ;;  %v2730_v40 = vmov -inf   ;;  %v2731_v45 = vmov 0  }
  0xa1   : > { %2060 = vmatprep.subr.mxu0 %v753_v0  ;;  %v751_v2 = vld [vmem:[%s3043_s14 + $0x68] sm:$0xff]  ;;  %v750_v3 = vld [vmem:[%s3043_s14 + $0x60] sm:$0xff]  ;;  %v3057_v4 = vld [vmem:[%s3015_s16] sm:$0xff]  ;;  %844 = vst.msk [vmem:[#allocation3] sm:$0xff] %vm843_vm0, %v2730_v40  ;;  %2381 = vset.pattern.permute.xlu0 %v2731_v45  ;;  %v2732_v46 = vmov 0.0   ;;  %s3238_s29 = scalar_lea.vmem [#allocation17], %s3023_s11 }
  0xa2   : > { %2061 = vmatpush3.msra.mxu0 %v753_v0  ;;  %v749_v5 = vld [vmem:[%s3043_s14 + $0x58] sm:$0xff]  ;;  %2092 = vmatprep.mubr.f32.mxu0 %v3057_v4  ;;  %v875_v6 = vld [vmem:[%s3026_s7 + $0x78] sm:$0xff]  ;;  %v874_v7 = vld [vmem:[%s3026_s7 + $0x70] sm:$0xff]  ;;  %845 = vst.msk [vmem:[#allocation3 + $0x8] sm:$0xff] %vm843_vm0, %v2730_v40  ;;  %s3492_s30 = sld [smem:[#allocation26_spill]] }
  0xa3   : > { %2062 = vmatprep.subr.mxu0 %v752_v1  ;;  %2098 = vmatprep.subr.mxu1 %v875_v6  ;;  %v748_v8 = vld [vmem:[%s3043_s14 + $0x50] sm:$0xff]  ;;  %v873_v9 = vld [vmem:[%s3026_s7 + $0x68] sm:$0xff]  ;;  %v747_v10 = vld [vmem:[%s3043_s14 + $0x48] sm:$0xff]  ;;  %846 = vst.msk [vmem:[#allocation3 + $0x10] sm:$0xff] %vm843_vm0, %v2730_v40  ;;  %s3493_s20 = sld [smem:[#allocation36_spill]] }
  0xa4   : > { %2063 = vmatpush3.msra.mxu0 %v752_v1  ;;  %2099 = vmatpush3.msra.mxu1 %v875_v6  ;;  %v872_v11 = vld [vmem:[%s3026_s7 + $0x60] sm:$0xff]  ;;  %v746_v12 = vld [vmem:[%s3043_s14 + $0x40] sm:$0xff]  ;;  %v871_v13 = vld [vmem:[%s3026_s7 + $0x58] sm:$0xff]  ;;  %847 = vst.msk [vmem:[#allocation3 + $0x18] sm:$0xff] %vm843_vm0, %v2730_v40  ;;  %s3494_s8 = sld [smem:[#allocation37_spill]] }
  0xa5   : > { %2064 = vmatprep.subr.mxu0 %v751_v2  ;;  %2100 = vmatprep.subr.mxu1 %v874_v7  ;;  %v745_v14 = vld [vmem:[%s3043_s14 + $0x38] sm:$0xff]  ;;  %v870_v15 = vld [vmem:[%s3026_s7 + $0x50] sm:$0xff]  ;;  %v744_v16 = vld [vmem:[%s3043_s14 + $0x30] sm:$0xff]  ;;  %848 = vst.msk [vmem:[#allocation4] sm:$0xff] %vm843_vm0, %v2732_v46  ;;  %s3495_s11 = sld [smem:[#allocation38_spill]] }
  0xa6   : > { %2065 = vmatpush3.msra.mxu0 %v751_v2  ;;  %2101 = vmatpush3.msra.mxu1 %v874_v7  ;;  %v869_v17 = vld [vmem:[%s3026_s7 + $0x48] sm:$0xff]  ;;  %v743_v18 = vld [vmem:[%s3043_s14 + $0x28] sm:$0xff]  ;;  %v868_v19 = vld [vmem:[%s3026_s7 + $0x40] sm:$0xff]  ;;  %849 = vst.msk [vmem:[#allocation4 + $0x8] sm:$0xff] %vm843_vm0, %v2732_v46  ;;  %s3498_s27 = sld [smem:[#allocation40_spill]] }
  0xa7   : > { %2066 = vmatprep.subr.mxu0 %v750_v3  ;;  %2102 = vmatprep.subr.mxu1 %v873_v9  ;;  %v742_v20 = vld [vmem:[%s3043_s14 + $0x20] sm:$0xff]  ;;  %v867_v21 = vld [vmem:[%s3026_s7 + $0x38] sm:$0xff]  ;;  %v741_v22 = vld [vmem:[%s3043_s14 + $0x18] sm:$0xff]  ;;  %850 = vst.msk [vmem:[#allocation4 + $0x10] sm:$0xff] %vm843_vm0, %v2732_v46 }
  0xa8   : > { %2067 = vmatpush3.msra.mxu0 %v750_v3  ;;  %2103 = vmatpush3.msra.mxu1 %v873_v9  ;;  %v866_v23 = vld [vmem:[%s3026_s7 + $0x30] sm:$0xff]  ;;  %v740_v24 = vld [vmem:[%s3043_s14 + $0x10] sm:$0xff]  ;;  %v865_v25 = vld [vmem:[%s3026_s7 + $0x28] sm:$0xff]  ;;  %851 = vst.msk [vmem:[#allocation4 + $0x18] sm:$0xff] %vm843_vm0, %v2732_v46  ;;  %p717_p8 = scmp.lt.s32.totalorder %s3492_s30, 1  ;;  %s1959_s13 = sshll.u32 %s3492_s30, 9 }
  0xa9   : > { %2068 = vmatprep.subr.mxu0 %v749_v5  ;;  %2104 = vmatprep.subr.mxu1 %v872_v11  ;;  %v739_v26 = vld [vmem:[%s3043_s14 + $0x8] sm:$0xff]  ;;  %v864_v27 = vld [vmem:[%s3026_s7 + $0x20] sm:$0xff]  ;;  %v738_v28 = vld [vmem:[%s3043_s14] sm:$0xff] }
  0xaa   : > { %2069 = vmatpush3.msra.mxu0 %v749_v5  ;;  %2105 = vmatpush3.msra.mxu1 %v872_v11  ;;  %v863_v29 = vld [vmem:[%s3026_s7 + $0x18] sm:$0xff]  ;;  %v3086_v30 = vld [vmem:[%s3015_s16 + $0x8] sm:$0xff]  ;;  %v862_v31 = vld [vmem:[%s3026_s7 + $0x10] sm:$0xff]  ;;  %s3308_s25 = scalar_select %p717_p8, %s3492_s30, 1 }
  0xab   : > { %2070 = vmatprep.subr.mxu0 %v748_v8  ;;  %2106 = vmatprep.subr.mxu1 %v871_v13  ;;  %v3090_v32 = vld [vmem:[%s3015_s16 + $0x10] sm:$0xff]  ;;  %v3095_v33 = vld [vmem:[%s3015_s16 + $0x18] sm:$0xff]  ;;  %v861_v34 = vld [vmem:[%s3026_s7 + $0x8] sm:$0xff]  ;;  %s2733_s30 = smov [#allocation18]  }
  0xac   : > { %2071 = vmatpush3.msra.mxu0 %v748_v8  ;;  %2107 = vmatpush3.msra.mxu1 %v871_v13  ;;  %v860_v35 = vld [vmem:[%s3026_s7] sm:$0xff]  ;;  %v1102_v47 = vld [vmem:[%s3034_s23 + $0x78] sm:$0xff]  ;;  %v1101_v48 = vld [vmem:[%s3034_s23 + $0x70] sm:$0xff]  ;;  %s719_s24 = scalar_lea.vmem %s3493_s20, %s3308_s25  ;;  %s722_s16 = scalar_lea.vmem %s3494_s8, %s3308_s25 }
  0xad   : > { %2072 = vmatprep.subr.mxu0 %v747_v10  ;;  %2108 = vmatprep.subr.mxu1 %v870_v15  ;;  %v1100_v49 = vld [vmem:[%s3034_s23 + $0x68] sm:$0xff]  ;;  %v1099_v50 = vld [vmem:[%s3034_s23 + $0x60] sm:$0xff]  ;;  %v1098_v52 = vld [vmem:[%s3034_s23 + $0x58] sm:$0xff]  ;;  %s725_s1 = scalar_lea.vmem %s3495_s11, %s3308_s25  ;;  %s3382_s28 = scalar_lea.hbm %s3498_s27, %s1959_s13 }
  0xae   : > { %2073 = vmatpush3.msra.mxu0 %v747_v10  ;;  %2109 = vmatpush3.msra.mxu1 %v870_v15  ;;  %v3124_v51 = vld [vmem:[#allocation3] sm:$0xff]  ;;  %v1097_v55 = vld [vmem:[%s3034_s23 + $0x50] sm:$0xff]  ;;  %v3131_v56 = vld [vmem:[#allocation3 + $0x8] sm:$0xff] }
  0xaf   : > { %2074 = vmatprep.subr.mxu0 %v746_v12  ;;  %2110 = vmatprep.subr.mxu1 %v869_v17  ;;  %v3133_v57 = vld [vmem:[#allocation3 + $0x10] sm:$0xff]  ;;  %v1096_v59 = vld [vmem:[%s3034_s23 + $0x48] sm:$0xff]  ;;  %v1095_v0 = vld [vmem:[%s3034_s23 + $0x40] sm:$0xff] }
  0xb0   : > { %2075 = vmatpush3.msra.mxu0 %v746_v12  ;;  %2111 = vmatpush3.msra.mxu1 %v869_v17  ;;  %v3148_v1 = vld [vmem:[#allocation3 + $0x18] sm:$0xff]  ;;  %v1093_v8 = vld [vmem:[%s3034_s23 + $0x30] sm:$0xff]  ;;  %v1092_v10 = vld [vmem:[%s3034_s23 + $0x28] sm:$0xff] }
  0xb1   : > { %2076 = vmatprep.subr.mxu0 %v745_v14  ;;  %2112 = vmatprep.subr.mxu1 %v868_v19  ;;  %v1094_v5 = vld [vmem:[%s3034_s23 + $0x38] sm:$0xff]  ;;  %v1091_v11 = vld [vmem:[%s3034_s23 + $0x20] sm:$0xff]  ;;  %v1089_v13 = vld [vmem:[%s3034_s23 + $0x10] sm:$0xff] }
  0xb2   : > { %2077 = vmatpush3.msra.mxu0 %v745_v14  ;;  %2113 = vmatpush3.msra.mxu1 %v868_v19  ;;  %v1090_v12 = vld [vmem:[%s3034_s23 + $0x18] sm:$0xff]  ;;  %v1088_v14 = vld [vmem:[%s3034_s23 + $0x8] sm:$0xff]  ;;  %v1087_v15 = vld [vmem:[%s3034_s23] sm:$0xff]  ;;  %s3496_s23 = sld [smem:[#allocation39_spill]] }
  0xb3   : > { %2078 = vmatprep.subr.mxu0 %v744_v16  ;;  %2114 = vmatprep.subr.mxu1 %v867_v21 }
  0xb4   : > { %2079 = vmatpush3.msra.mxu0 %v744_v16  ;;  %2115 = vmatpush3.msra.mxu1 %v867_v21 }
  0xb5   : > { %2080 = vmatprep.subr.mxu0 %v743_v18  ;;  %2116 = vmatprep.subr.mxu1 %v866_v23 }
  0xb6   : > { %2081 = vmatpush3.msra.mxu0 %v743_v18  ;;  %2117 = vmatpush3.msra.mxu1 %v866_v23  ;;  %v1021_v23 = vld [vmem:[%s3036_s3] sm:$0xff]  ;;  %s714_s3 = scalar_lea.vmem [#allocation18], %s1936_s15  ;;  %s1634_s15 = scalar_lea.sflag [#allocation8], %s3009_s10 }
  0xb7   : > { %2082 = vmatprep.subr.mxu0 %v742_v20  ;;  %2118 = vmatprep.subr.mxu1 %v865_v25 }
  0xb8   : > { %2083 = vmatpush3.msra.mxu0 %v742_v20  ;;  %2119 = vmatpush3.msra.mxu1 %v865_v25  ;;  %s728_s19 = scalar_lea.vmem %s3496_s23, %s3308_s25 }
  0xb9   : > { %2084 = vmatprep.subr.mxu0 %v741_v22  ;;  %2120 = vmatprep.subr.mxu1 %v864_v27 }
  0xba   : > { %2085 = vmatpush3.msra.mxu0 %v741_v22  ;;  %2121 = vmatpush3.msra.mxu1 %v864_v27 }
  0xbb   : > { %2086 = vmatprep.subr.mxu0 %v740_v24  ;;  %2122 = vmatprep.subr.mxu1 %v863_v29 }
  0xbc   : > { %2087 = vmatpush3.msra.mxu0 %v740_v24  ;;  %2123 = vmatpush3.msra.mxu1 %v863_v29 }
  0xbd   : > { %2088 = vmatprep.subr.mxu0 %v739_v26  ;;  %2124 = vmatprep.subr.mxu1 %v862_v31 }
  0xbe   : > { %2089 = vmatpush3.msra.mxu0 %v739_v26  ;;  %2125 = vmatpush3.msra.mxu1 %v862_v31  ;;  %v1022_v26 = vunpack.c.0.s8 %v1021_v23 }
  0xbf   : > { %2090 = vmatprep.subr.mxu0 %v738_v28  ;;  %2126 = vmatprep.subr.mxu1 %v861_v34 }
  0xc0   : > { %2091 = vmatpush3.msra.mxu0 %v738_v28  ;;  %2127 = vmatpush3.msra.mxu1 %v861_v34  ;;  %v1026_v31 = vcvt.s32.f32 %v1022_v26  ;;  %v1023_v34 = vunpack.c.1.s8 %v1021_v23 }
  0xc1   : > { %2093 = vmatmul.mubr.f32.vlgmr.msra.gmra.mxu0 %v3086_v30  ;;  %2128 = vmatprep.subr.mxu1 %v860_v35 }
  0xc2   : > { %2095 = vmatprep.mubr.f32.mxu0 %v3090_v32  ;;  %2129 = vmatpush3.msra.mxu1 %v860_v35 }
  0xc3   : > { %2382 = vset.pattern.permute.xlu1 %v2731_v45  ;;  %2136 = vmatprep.subr.mxu0 %v1102_v47 }
  0xc4   : > { %2137 = vmatpush3.msra.mxu0 %v1102_v47 }
  0xc5   : > { %2096 = vmatmul.mubr.f32.gmra.mxu0 %v3095_v33  ;;  %2138 = vmatprep.subr.mxu0 %v1101_v48 }
  0xc6   : > { %2139 = vmatpush3.msra.mxu0 %v1101_v48 }
  0xc7   : > { %2140 = vmatprep.subr.mxu0 %v1100_v49 }
  0xc8   : > { %2141 = vmatpush3.msra.mxu0 %v1100_v49 }
  0xc9   : > { %2142 = vmatprep.subr.mxu0 %v1099_v50 }
  0xca   : > { %2143 = vmatpush3.msra.mxu0 %v1099_v50 }
  0xcb   : > { %2144 = vmatprep.subr.mxu0 %v1098_v52 }
  0xcc   : > { %2145 = vmatpush3.msra.mxu0 %v1098_v52 }
  0xcd   : > { %2146 = vmatprep.subr.mxu0 %v1097_v55 }
  0xce   : > { %2147 = vmatpush3.msra.mxu0 %v1097_v55 }
  0xcf   : > { %2148 = vmatprep.subr.mxu0 %v1096_v59 }
  0xd0   : > { %2149 = vmatpush3.msra.mxu0 %v1096_v59 }
  0xd1   : > { %2150 = vmatprep.subr.mxu0 %v1095_v0 }
  0xd2   : > { %2151 = vmatpush3.msra.mxu0 %v1095_v0 }
  0xd3   : > { %2152 = vmatprep.subr.mxu0 %v1094_v5 }
  0xd4   : > { %2153 = vmatpush3.msra.mxu0 %v1094_v5 }
  0xd5   : > { %2154 = vmatprep.subr.mxu0 %v1093_v8 }
  0xd6   : > { %2155 = vmatpush3.msra.mxu0 %v1093_v8 }
  0xd7   : > { %2156 = vmatprep.subr.mxu0 %v1092_v10 }
  0xd8   : > { %2157 = vmatpush3.msra.mxu0 %v1092_v10 }
  0xd9   : > { %2158 = vmatprep.subr.mxu0 %v1091_v11 }
  0xda   : > { %2159 = vmatpush3.msra.mxu0 %v1091_v11 }
  0xdb   : > { %2160 = vmatprep.subr.mxu0 %v1090_v12 }
  0xdc   : > { %2161 = vmatpush3.msra.mxu0 %v1090_v12  ;;  %v1036_v12 = vld [vmem:[#allocation4 + $0x10] sm:$0xff] }
  0xdd   : > { %2162 = vmatprep.subr.mxu0 %v1089_v13 }
  0xde   : > { %2163 = vmatpush3.msra.mxu0 %v1089_v13 }
  0xdf   : > { %2164 = vmatprep.subr.mxu0 %v1088_v14 }
  0xe0   : > { %2165 = vmatpush3.msra.mxu0 %v1088_v14 }
  0xe1   : > { %2166 = vmatprep.subr.mxu0 %v1087_v15 }
  0xe2   : > { %2167 = vmatpush3.msra.mxu0 %v1087_v15 }
 0x181   : > { %v2094_v36 = vpop.f32.mrf.mxu0 }
 0x183   : > { %v820_v37 = vpop.f32.mrf.mxu0 }
 0x184   : > { %2130 = vmatprep.mubr.f32.mxu1 %v820_v37  ;;  %v1027_v37 = vcvt.s32.f32 %v1023_v34 }
 0x185   : > { %v2097_v38 = vpop.f32.mrf.mxu0  ;;  %2131 = vmatmul.mubr.f32.vlgmr.msra.gmra.mxu1 %v2094_v36 }
 0x187   : > { %v830_v39 = vpop.f32.mrf.mxu0 }
 0x188   : > { %2133 = vmatprep.mubr.f32.mxu1 %v830_v39 }
 0x189   : > { %2134 = vmatmul.mubr.f32.gmra.mxu1 %v2097_v38  ;;  %v1024_v38 = vunpack.c.2.s8 %v1021_v23 }
 0x245   : > { %v3104_v41 = vpop.f32.mrf.mxu1 }
 0x247   : > { %v3106_v42 = vpop.f32.mrf.mxu1 }
 0x248   : > { %965 = vmax.xlane.f32.xlu0 %v3106_v42 }
 0x249   : > { %v3109_v43 = vpop.f32.mrf.mxu1 }
 0x24b   : > { %v3111_v44 = vpop.f32.mrf.mxu1 }
 0x24c   : > { %967 = vmax.xlane.f32.xlu0 %v3104_v41  ;;  %969 = vmax.xlane.f32.xlu1 %v3111_v44 }
 0x250   : > { %971 = vmax.xlane.f32.xlu1 %v3109_v43 }
 0x2d1   : > { %v966_v53 = vpop.xlane.xlu0 %965 }
 0x2d2   : > { %v3128_v54 = vmax.f32 %v3124_v51, %v966_v53 }
 0x2d4   : > { %v977_v58 = vsub.f32 %v3124_v51, %v3128_v54  ;;  %1196 = vst.msk [vmem:[#allocation3] sm:$0xff] %vm843_vm0, %v3128_v54  ;;  %991 = vperm.xlu0 %2381, %v3128_v54  }
 0x2d5   : > { %v968_v60 = vpop.xlane.xlu0 %967  ;;  %v970_v61 = vpop.xlane.xlu1 %969 }
 0x2d6   : > { %v3142_v62 = vmax.f32 %v3131_v56, %v968_v60  ;;  %v3145_v63 = vmax.f32 %v3133_v57, %v970_v61  ;;  %v981_v49 = vmul.f32 1.442695, %v977_v58 }
 0x2d8   : > { %v978_v2 = vsub.f32 %v3131_v56, %v3142_v62  ;;  %1197 = vst.msk [vmem:[#allocation3 + $0x8] sm:$0xff] %vm843_vm0, %v3142_v62  ;;  %v979_v3 = vsub.f32 %v3133_v57, %v3145_v63  ;;  %1198 = vst.msk [vmem:[#allocation3 + $0x10] sm:$0xff] %vm843_vm0, %v3145_v63  ;;  %996 = vperm.xlu1 %2382, %v3142_v62  }
 0x2d9   : > { %v972_v6 = vpop.xlane.xlu1 %971 }
 0x2da   : > { %v3161_v7 = vmax.f32 %v3148_v1, %v972_v6  ;;  %v985_v50 = vmul.f32 1.442695, %v979_v3 }
 0x2db   : > { %v1207_v56 = vld [vmem:[#allocation3] sm:$0xff] }
 0x2dc   : > { %v980_v9 = vsub.f32 %v3148_v1, %v3161_v7  ;;  %1199 = vst.msk [vmem:[#allocation3 + $0x18] sm:$0xff] %vm843_vm0, %v3161_v7  ;;  %1001 = vperm.xlu1 %2382, %v3145_v63   ;;  %v1211_v58 = vsub.f32 0.0, %v1207_v56  ;;  %v1034_v1 = vld [vmem:[#allocation4] sm:$0xff] }
 0x2de   : > { %v987_v52 = vmul.f32 1.442695, %v980_v9  ;;  %v1215_v60 = vmul.f32 1.442695, %v1211_v58 }
 0x2df   : > { %v1208_v59 = vld [vmem:[#allocation3 + $0x8] sm:$0xff]  ;;  %v1209_v61 = vld [vmem:[#allocation3 + $0x10] sm:$0xff] }
 0x2e0   : > { %1006 = vperm.xlu1 %2382, %v3161_v7   ;;  %v1212_v57 = vsub.f32 0.0, %v1208_v59  ;;  %v1213_v63 = vsub.f32 0.0, %v1209_v61  ;;  %v1035_v7 = vld [vmem:[#allocation4 + $0x8] sm:$0xff] }
 0x2e2   : > { %v1217_v62 = vmul.f32 1.442695, %v1212_v57 }
 0x2e3   : > { %v1210_v0 = vld [vmem:[#allocation3 + $0x18] sm:$0xff] }
 0x2e4   : > { %v1214_v3 = vsub.f32 0.0, %v1210_v0 }
 0x2e6   : > { %v1221_v9 = vmul.f32 1.442695, %v1214_v3 }
 0x34f   : > { %v992_v16 = vpop.permute.xlu0 %991 }
 0x350   : > { %v1009_v17 = vsub.f32 %v3106_v42, %v992_v16  ;;  %v1025_v42 = vunpack.c.3.s8 %v1021_v23 }
 0x352   : > { %v1013_v18 = vmul.f32 1.442695, %v1009_v17  ;;  %v1029_v46 = vcvt.s32.f32 %v1025_v42  ;;  %v1037_v17 = vld [vmem:[#allocation4 + $0x18] sm:$0xff] }
 0x353   : > { %v997_v19 = vpop.permute.xlu1 %996 }
 0x354   : > { %2383 = vpow2.f32 %v1013_v18  ;;  %v1010_v20 = vsub.f32 %v3104_v41, %v997_v19  ;;  %v1028_v41 = vcvt.s32.f32 %v1024_v38 }
 0x356   : > { %v1015_v21 = vmul.f32 1.442695, %v1010_v20 }
 0x357   : > { %v1002_v22 = vpop.permute.xlu1 %1001 }
 0x358   : > { %2385 = vpow2.f32 %v1015_v21  ;;  %v1011_v24 = vsub.f32 %v3111_v44, %v1002_v22 }
 0x35a   : > { %v1017_v25 = vmul.f32 1.442695, %v1011_v24 }
 0x35b   : > { %v1007_v27 = vpop.permute.xlu1 %1006 }
 0x35c   : > { %2387 = vpow2.f32 %v1017_v25  ;;  %v1012_v28 = vsub.f32 %v3109_v43, %v1007_v27  ;;  %v983_v43 = vmul.f32 1.442695, %v978_v2  ;;  %v1219_v2 = vmul.f32 1.442695, %v1213_v63 }
 0x35e   : > { %v1019_v29 = vmul.f32 1.442695, %v1012_v28 }
 0x360   : > { %2389 = vpow2.f32 %v1019_v29 }
 0x361   : > { %v2384_v35 = vpop.eup %2383  ;;  %2391 = vpow2.f32 %v983_v43 }
 0x362   : > { %v1030_v36 = vmul.f32 %v2384_v35, %v1026_v31  ;;  %2393 = vpow2.f32 %v981_v49 }
 0x363   : > { %2395 = vpow2.f32 %v985_v50 }
 0x364   : > { %2168 = vmatprep.mubr.f32.mxu0 %v1030_v36  ;;  %1042 = vadd.xlane.f32.xlu1 %v1030_v36  ;;  %2397 = vpow2.f32 %v987_v52 }
 0x365   : > { %v2386_v39 = vpop.eup %2385  ;;  %2399 = vpow2.f32 %v1215_v60 }
 0x366   : > { %v1031_v40 = vmul.f32 %v2386_v39, %v1027_v37  ;;  %2401 = vpow2.f32 %v1217_v62 }
 0x367   : > { %2403 = vpow2.f32 %v1219_v2 }
 0x368   : > { %1044 = vadd.xlane.f32.xlu0 %v1031_v40  ;;  %2169 = vmatmul.mubr.f32.vlgmr.msra.gmra.mxu0 %v1031_v40  ;;  %2405 = vpow2.f32 %v1221_v9  ;;  %v1360_v9 = vld [vmem:[%s3046_s5 + $0x78] sm:$0xff] }
 0x369   : > { %v2388_v44 = vpop.eup %2387  ;;  %2174 = vmatprep.subr.mxu1 %v1360_v9 }
 0x36a   : > { %v1032_v45 = vmul.f32 %v2388_v44, %v1028_v41  ;;  %2175 = vmatpush3.msra.mxu1 %v1360_v9 }
 0x36c   : > { %1046 = vadd.xlane.f32.xlu1 %v1032_v45  ;;  %2171 = vmatprep.mubr.f32.mxu0 %v1032_v45 }
 0x36d   : > { %v2390_v47 = vpop.eup %2389 }
 0x36e   : > { %v1033_v48 = vmul.f32 %v2390_v47, %v1029_v46  ;;  %v2392_v53 = vpop.eup %2391 }
 0x36f   : > { %v2394_v55 = vpop.eup %2393  ;;  %v1039_v10 = vmul.f32 %v2392_v53, %v1035_v7 }
 0x370   : > { %1048 = vadd.xlane.f32.xlu1 %v1033_v48  ;;  %2172 = vmatmul.mubr.f32.gmra.mxu0 %v1033_v48  ;;  %v2396_v51 = vpop.eup %2395  ;;  %v1038_v5 = vmul.f32 %v2394_v55, %v1034_v1 }
 0x371   : > { %v2398_v54 = vpop.eup %2397  ;;  %v1040_v15 = vmul.f32 %v2396_v51, %v1036_v12  ;;  %v1357_v12 = vld [vmem:[%s3046_s5 + $0x60] sm:$0xff] }
 0x372   : > { %v2400_v14 = vpop.eup %2399  ;;  %v1041_v22 = vmul.f32 %v2398_v54, %v1037_v17  ;;  %v1352_v17 = vld [vmem:[%s3046_s5 + $0x38] sm:$0xff] }
 0x373   : > { %v1223_v19 = vmul.f32 1e-06, %v2400_v14  ;;  %v2402_v20 = vpop.eup %2401  ;;  %v1355_v14 = vld [vmem:[%s3046_s5 + $0x50] sm:$0xff] }
 0x374   : > { %v1224_v26 = vmul.f32 1e-06, %v2402_v20  ;;  %v2404_v27 = vpop.eup %2403  ;;  %v1349_v20 = vld [vmem:[%s3046_s5 + $0x20] sm:$0xff] }
 0x375   : > { %v1225_v31 = vmul.f32 1e-06, %v2404_v27  ;;  %v2406_v34 = vpop.eup %2405  ;;  %v3250_v27 = vld [vmem:[%s3238_s29 + $0x68] sm:$0xff] }
 0x376   : > { %v1226_v37 = vmul.f32 1e-06, %v2406_v34  ;;  %v3270_v34 = vld [vmem:[%s3238_s29 + $0x48] sm:$0xff] }
 0x37e   : > { %1070 = vperm.xlu0 %2381, %v2392_v53  }
 0x381   : > { %1065 = vperm.xlu1 %2382, %v2394_v55  }
 0x385   : > { %1075 = vperm.xlu1 %2382, %v2396_v51  }
 0x389   : > { %1080 = vperm.xlu1 %2382, %v2398_v54  }
 0x3ed   : > { %v1043_v6 = vpop.xlane.xlu1 %1042 }
 0x3ee   : > { %v1050_v8 = vadd.f32 %v1043_v6, %v1038_v5 }
 0x3f0   : > { %1055 = vst.msk [vmem:[#allocation4] sm:$0xff] %vm843_vm0, %v1050_v8 }
 0x3f1   : > { %v1045_v11 = vpop.xlane.xlu0 %1044 }
 0x3f2   : > { %v1051_v13 = vadd.f32 %v1045_v11, %v1039_v10 }
 0x3f4   : > { %1056 = vst.msk [vmem:[#allocation4 + $0x8] sm:$0xff] %vm843_vm0, %v1051_v13  ;;  %v1356_v13 = vld [vmem:[%s3046_s5 + $0x58] sm:$0xff] }
 0x3f5   : > { %v1047_v16 = vpop.xlane.xlu1 %1046 }
 0x3f6   : > { %v1052_v18 = vadd.f32 %v1047_v16, %v1040_v15  ;;  %v1354_v15 = vld [vmem:[%s3046_s5 + $0x48] sm:$0xff]  ;;  %v1353_v16 = vld [vmem:[%s3046_s5 + $0x40] sm:$0xff] }
 0x3f7   : > { %v1203_v21 = vld [vmem:[#allocation4] sm:$0xff] }
 0x3f8   : > { %1057 = vst.msk [vmem:[#allocation4 + $0x10] sm:$0xff] %vm843_vm0, %v1052_v18  ;;  %v1227_v23 = vadd.f32 %v1223_v19, %v1203_v21  ;;  %v1351_v18 = vld [vmem:[%s3046_s5 + $0x30] sm:$0xff]  ;;  %v1350_v19 = vld [vmem:[%s3046_s5 + $0x28] sm:$0xff]  ;;  %v1348_v21 = vld [vmem:[%s3046_s5 + $0x18] sm:$0xff] }
 0x3f9   : > { %v1049_v24 = vpop.xlane.xlu1 %1048  ;;  %v1071_v50 = vpop.permute.xlu0 %1070 }
 0x3fa   : > { %v1053_v25 = vadd.f32 %v1049_v24, %v1041_v22  ;;  %2407 = vrcp.f32 %v1227_v23  ;;  %v1084_v55 = vmul.f32 0.0, %v1071_v50  ;;  %v1347_v22 = vld [vmem:[%s3046_s5 + $0x10] sm:$0xff]  ;;  %v1346_v23 = vld [vmem:[%s3046_s5 + $0x8] sm:$0xff]  ;;  %v1345_v24 = vld [vmem:[%s3046_s5] sm:$0xff] }
 0x3fb   : > { %v1204_v28 = vld [vmem:[#allocation4 + $0x8] sm:$0xff] }
 0x3fc   : > { %1058 = vst.msk [vmem:[#allocation4 + $0x18] sm:$0xff] %vm843_vm0, %v1053_v25  ;;  %v1228_v29 = vadd.f32 %v1224_v26, %v1204_v28  ;;  %v3241_v25 = vld [vmem:[%s3238_s29 + $0x78] sm:$0xff]  ;;  %v3244_v26 = vld [vmem:[%s3238_s29 + $0x70] sm:$0xff]  ;;  %v3255_v28 = vld [vmem:[%s3238_s29 + $0x60] sm:$0xff] }
 0x3fd   : > { %v1066_v45 = vpop.permute.xlu1 %1065  ;;  %2212 = vmatprep.subr.mxu0 %v3241_v25 }
 0x3fe   : > { %2409 = vrcp.f32 %v1228_v29  ;;  %v1083_v49 = vmul.f32 0.0, %v1066_v45  ;;  %2213 = vmatpush3.msra.mxu0 %v3241_v25  ;;  %v3260_v29 = vld [vmem:[%s3238_s29 + $0x58] sm:$0xff] }
 0x3ff   : > { %v1205_v35 = vld [vmem:[#allocation4 + $0x10] sm:$0xff]  ;;  %2214 = vmatprep.subr.mxu0 %v3244_v26 }
 0x400   : > { %v1229_v36 = vadd.f32 %v1225_v31, %v1205_v35  ;;  %2215 = vmatpush3.msra.mxu0 %v3244_v26  ;;  %v3265_v31 = vld [vmem:[%s3238_s29 + $0x50] sm:$0xff]  ;;  %v3275_v35 = vld [vmem:[%s3238_s29 + $0x40] sm:$0xff] }
 0x401   : > { %v1076_v46 = vpop.permute.xlu1 %1075  ;;  %2216 = vmatprep.subr.mxu0 %v3250_v27 }
 0x402   : > { %2411 = vrcp.f32 %v1229_v36  ;;  %v1085_v61 = vmul.f32 0.0, %v1076_v46  ;;  %2217 = vmatpush3.msra.mxu0 %v3250_v27  ;;  %v3280_v36 = vld [vmem:[%s3238_s29 + $0x38] sm:$0xff] }
 0x403   : > { %v1206_v38 = vld [vmem:[#allocation4 + $0x18] sm:$0xff]  ;;  %2218 = vmatprep.subr.mxu0 %v3255_v28 }
 0x404   : > { %v1230_v39 = vadd.f32 %v1226_v37, %v1206_v38  ;;  %2219 = vmatpush3.msra.mxu0 %v3255_v28  ;;  %v3285_v37 = vld [vmem:[%s3238_s29 + $0x30] sm:$0xff]  ;;  %v3290_v38 = vld [vmem:[%s3238_s29 + $0x28] sm:$0xff] }
 0x405   : > { %v1081_v47 = vpop.permute.xlu1 %1080  ;;  %2220 = vmatprep.subr.mxu0 %v3260_v29 }
 0x406   : > { %2413 = vrcp.f32 %v1230_v39  ;;  %v1086_v0 = vmul.f32 0.0, %v1081_v47  ;;  %2221 = vmatpush3.msra.mxu0 %v3260_v29  ;;  %v3295_v39 = vld [vmem:[%s3238_s29 + $0x20] sm:$0xff] }
 0x407   : > { %v2408_v40 = vpop.eup %2407  ;;  %2222 = vmatprep.subr.mxu0 %v3265_v31 }
 0x408   : > { %1241 = vperm.xlu1 %2382, %v2408_v40   ;;  %2223 = vmatpush3.msra.mxu0 %v3265_v31  ;;  %v3300_v40 = vld [vmem:[%s3238_s29 + $0x18] sm:$0xff] }
 0x409   : > { %2224 = vmatprep.subr.mxu0 %v3270_v34 }
 0x40a   : > { %2225 = vmatpush3.msra.mxu0 %v3270_v34 }
 0x40b   : > { %v2410_v41 = vpop.eup %2409  ;;  %2226 = vmatprep.subr.mxu0 %v3275_v35 }
 0x40c   : > { %1246 = vperm.xlu0 %2381, %v2410_v41   ;;  %2227 = vmatpush3.msra.mxu0 %v3275_v35 }
 0x40d   : > { %2228 = vmatprep.subr.mxu0 %v3280_v36 }
 0x40e   : > { %2229 = vmatpush3.msra.mxu0 %v3280_v36 }
 0x40f   : > { %v2412_v42 = vpop.eup %2411  ;;  %2230 = vmatprep.subr.mxu0 %v3285_v37 }
 0x410   : > { %1251 = vperm.xlu1 %2382, %v2412_v42   ;;  %2231 = vmatpush3.msra.mxu0 %v3285_v37 }
 0x411   : > { %2232 = vmatprep.subr.mxu0 %v3290_v38 }
 0x412   : > { %2233 = vmatpush3.msra.mxu0 %v3290_v38 }
 0x413   : > { %v2414_v44 = vpop.eup %2413  ;;  %2234 = vmatprep.subr.mxu0 %v3295_v39 }
 0x414   : > { %1256 = vperm.xlu0 %2381, %v2414_v44   ;;  %2235 = vmatpush3.msra.mxu0 %v3295_v39 }
 0x415   : > { %2236 = vmatprep.subr.mxu0 %v3300_v40 }
 0x416   : > { %2237 = vmatpush3.msra.mxu0 %v3300_v40 }
 0x428   : > { %v2170_v43 = vpop.f32.mrf.mxu0 }
 0x429   : > { %v1189_v56 = vadd.f32 %v2170_v43, %v1084_v55 }
 0x42a   : > { %v1169_v48 = vpop.f32.mrf.mxu0 }
 0x42b   : > { %v1188_v52 = vadd.f32 %v1169_v48, %v1083_v49 }
 0x430   : > { %v2173_v54 = vpop.f32.mrf.mxu0 }
 0x432   : > { %v1179_v57 = vpop.f32.mrf.mxu0 }
 0x433   : > { %v1190_v1 = vadd.f32 %v1179_v57, %v1085_v61 }
 0x483   : > { %v1242_v53 = vpop.permute.xlu1 %1241 }
 0x484   : > { %v1259_v51 = vmul.f32 %v1242_v53, %v1188_v52 }
 0x486   : > { %v3198_v58 = vadd.f32 %v1259_v51, %v3057_v4  ;;  %v1191_v4 = vadd.f32 %v2173_v54, %v1086_v0 }
 0x487   : > { %v1247_v59 = vpop.permute.xlu0 %1246 }
 0x488   : > { %v1260_v60 = vmul.f32 %v1247_v59, %v1189_v56  ;;  %1271 = vadd.xlane.f32.xlu1 %v3198_v58  ;;  %v1283_v5 = vmul.f32 %v3198_v58, %v3198_v58 }
 0x48a   : > { %v3202_v62 = vadd.f32 %v1260_v60, %v3086_v30 }
 0x48b   : > { %v1252_v63 = vpop.permute.xlu1 %1251 }
 0x48c   : > { %1273 = vadd.xlane.f32.xlu0 %v3202_v62  ;;  %v1284_v2 = vmul.f32 %v3202_v62, %v3202_v62  ;;  %v1261_v3 = vmul.f32 %v1252_v63, %v1190_v1 }
 0x48e   : > { %1289 = vadd.xlane.f32.xlu1 %v1284_v2  ;;  %v3210_v7 = vadd.f32 %v1261_v3, %v3090_v32  ;;  %v1359_v32 = vld [vmem:[%s3046_s5 + $0x70] sm:$0xff] }
 0x48f   : > { %v1257_v6 = vpop.permute.xlu0 %1256  ;;  %2176 = vmatprep.subr.mxu1 %v1359_v32 }
 0x490   : > { %v1262_v30 = vmul.f32 %v1257_v6, %v1191_v4  ;;  %1287 = vadd.xlane.f32.xlu0 %v1283_v5  ;;  %v1285_v11 = vmul.f32 %v3210_v7, %v3210_v7  ;;  %2177 = vmatpush3.msra.mxu1 %v1359_v32 }
 0x492   : > { %v3213_v8 = vadd.f32 %v1262_v30, %v3095_v33  ;;  %v1358_v33 = vld [vmem:[%s3046_s5 + $0x68] sm:$0xff]  ;;  %s1649_s5 = sshll.u32 %s714_s3, 4  ;;  %s3384_s5 = int_to_ptr.vmem [resolvable:$true] %s1649_s5 }
 0x493   : > { %2178 = vmatprep.subr.mxu1 %v1358_v33  ;;  %s2627_s20 = scalar_lea.vmem %s3384_s5, 512 }
 0x494   : > { %1277 = vadd.xlane.f32.xlu1 %v3213_v8  ;;  %1275 = vadd.xlane.f32.xlu0 %v3210_v7  ;;  %v1286_v10 = vmul.f32 %v3213_v8, %v3213_v8  ;;  %p2628_p0 = scmp.ne.s32.totalorder %s3384_s5, %s2627_s20 }
 0x495   : > { %2179 = vmatpush3.msra.mxu1 %v1358_v33 }
 0x496   : > { %2180 = vmatprep.subr.mxu1 %v1357_v12  ;;  %p2629_p1 = pnand %p2628_p0, %p2851_p9 }
 0x497   : > { %2181 = vmatpush3.msra.mxu1 %v1357_v12 }
 0x498   : > { %1293 = vadd.xlane.f32.xlu1 %v1286_v10  ;;  %1291 = vadd.xlane.f32.xlu0 %v1285_v11  ;;  %v1944_v11 = vld [vmem:[%s719_s24] ss:$0 sm:$0xff]  ;;  %p2630_p3 = pneg %p2629_p1  ;;  %s2631_s24 = sshll.u32 %s2733_s30, 4  ;;  %s2632_s24 = int_to_ptr.vmem [resolvable:$false] %s2631_s24 }
 0x499   : > { %2182 = vmatprep.subr.mxu1 %v1356_v13  ;;  %s2633_s9 = scalar_lea.vmem %s2632_s24, 1024  ;;  %p2634_p4 = scmp.lt.s32.totalorder %s3384_s5, %s2632_s24 }
 0x49a   : > { %2183 = vmatpush3.msra.mxu1 %v1356_v13  ;;  %p2635_p5 = scmp.lt.s32.totalorder %s2633_s9, %s2627_s20 }
 0x49b   : > { %2184 = vmatprep.subr.mxu1 %v1355_v14 }
 0x49c   : > { %2185 = vmatpush3.msra.mxu1 %v1355_v14  ;;  %p2636_p6 = por %p2635_p5, %p2634_p4 }
 0x49d   : > { %2186 = vmatprep.subr.mxu1 %v1354_v15 }
 0x49e   : > { %2187 = vmatpush3.msra.mxu1 %v1354_v15  ;;  %v1945_v15 = vld [vmem:[%s722_s16] ss:$0 sm:$0xff]  ;;  %p2637_p7 = pnand %p2636_p6, %p2630_p3 }
 0x49f   : > { %2188 = vmatprep.subr.mxu1 %v1353_v16 }
 0x4a0   : > { %2189 = vmatpush3.msra.mxu1 %v1353_v16 }
 0x4a1   : > { %2190 = vmatprep.subr.mxu1 %v1352_v17 }
 0x4a2   : > { %2191 = vmatpush3.msra.mxu1 %v1352_v17 }
 0x4a3   : > { %2192 = vmatprep.subr.mxu1 %v1351_v18 }
 0x4a4   : > { %2193 = vmatpush3.msra.mxu1 %v1351_v18 }
 0x4a5   : > { %2194 = vmatprep.subr.mxu1 %v1350_v19 }
 0x4a6   : > { %2195 = vmatpush3.msra.mxu1 %v1350_v19 }
 0x4a7   : > { %2196 = vmatprep.subr.mxu1 %v1349_v20 }
 0x4a8   : > { %2197 = vmatpush3.msra.mxu1 %v1349_v20 }
 0x4a9   : > { %2198 = vmatprep.subr.mxu1 %v1348_v21 }
 0x4aa   : > { %2199 = vmatpush3.msra.mxu1 %v1348_v21 }
 0x4ab   : > { %2200 = vmatprep.subr.mxu1 %v1347_v22 }
 0x4ac   : > { %2201 = vmatpush3.msra.mxu1 %v1347_v22 }
 0x4ad   : > { %2202 = vmatprep.subr.mxu1 %v1346_v23 }
 0x4ae   : > { %2203 = vmatpush3.msra.mxu1 %v1346_v23 }
 0x4af   : > { %2204 = vmatprep.subr.mxu1 %v1345_v24 }
 0x4b0   : > { %2205 = vmatpush3.msra.mxu1 %v1345_v24  ;;  %v1452_v24 = vld [vmem:[%s3238_s29 + $0x10] sm:$0xff] }
 0x4b1   : > { %2250 = vmatprep.subr.mxu1 %v3241_v25  ;;  %2238 = vmatprep.subr.mxu0 %v1452_v24 }
 0x4b2   : > { %2239 = vmatpush3.msra.mxu0 %v1452_v24 }
 0x511   : > { %v1272_v41 = vpop.xlane.xlu1 %1271 }
 0x512   : > { %v1279_v44 = vmul.f32 0.03125, %v1272_v41 }
 0x514   : > { %v1299_v49 = vmul.f32 %v1279_v44, %v1279_v44  ;;  %v1307_v10 = vsub.f32 %v3198_v58, %v1279_v44 }
 0x515   : > { %v1274_v42 = vpop.xlane.xlu0 %1273 }
 0x516   : > { %v1280_v45 = vmul.f32 0.03125, %v1274_v42 }
 0x517   : > { %v1290_v46 = vpop.xlane.xlu1 %1289 }
 0x518   : > { %v1300_v43 = vmul.f32 %v1280_v45, %v1280_v45  ;;  %v1296_v47 = vmul.f32 0.03125, %v1290_v46  ;;  %v1308_v30 = vsub.f32 %v3202_v62, %v1280_v45 }
 0x519   : > { %v1288_v48 = vpop.xlane.xlu0 %1287 }
 0x51a   : > { %v1304_v50 = vsub.f32 %v1296_v47, %v1300_v43  ;;  %v1295_v52 = vmul.f32 0.03125, %v1288_v48 }
 0x51c   : > { %v1312_v53 = vadd.f32 1e-05, %v1304_v50  ;;  %v1303_v55 = vsub.f32 %v1295_v52, %v1299_v49 }
 0x51d   : > { %v1276_v51 = vpop.xlane.xlu0 %1275  ;;  %v1278_v54 = vpop.xlane.xlu1 %1277 }
 0x51e   : > { %2415 = vrsqrt.f32 %v1312_v53  ;;  %v1311_v56 = vadd.f32 1e-05, %v1303_v55  ;;  %v1281_v59 = vmul.f32 0.03125, %v1276_v51  ;;  %v1282_v60 = vmul.f32 0.03125, %v1278_v54 }
 0x520   : > { %2417 = vrsqrt.f32 %v1311_v56  ;;  %v1301_v63 = vmul.f32 %v1281_v59, %v1281_v59  ;;  %v1302_v0 = vmul.f32 %v1282_v60, %v1282_v60  ;;  %v1309_v62 = vsub.f32 %v3210_v7, %v1281_v59 }
 0x521   : > { %v1292_v57 = vpop.xlane.xlu0 %1291  ;;  %v1294_v61 = vpop.xlane.xlu1 %1293  ;;  %v1310_v18 = vsub.f32 %v3213_v8, %v1282_v60 }
 0x522   : > { %v1297_v1 = vmul.f32 0.03125, %v1292_v57  ;;  %v1298_v2 = vmul.f32 0.03125, %v1294_v61 }
 0x524   : > { %v1305_v4 = vsub.f32 %v1297_v1, %v1301_v63  ;;  %v1306_v3 = vsub.f32 %v1298_v2, %v1302_v0 }
 0x526   : > { %v1313_v5 = vadd.f32 1e-05, %v1305_v4  ;;  %v1314_v6 = vadd.f32 1e-05, %v1306_v3 }
 0x528   : > { %2419 = vrsqrt.f32 %v1313_v5 }
 0x529   : > { %2421 = vrsqrt.f32 %v1314_v6 }
 0x52b   : > { %v2416_v9 = vpop.eup %2415 }
 0x52c   : > { %v1320_v32 = vmul.f32 %v2416_v9, %v1308_v30 }
 0x52d   : > { %v2418_v33 = vpop.eup %2417 }
 0x52e   : > { %v1319_v12 = vmul.f32 %v2418_v33, %v1307_v10  ;;  %v1331_v13 = vmul.f32 %v1944_v11, %v1320_v32 }
 0x530   : > { %v1330_v14 = vmul.f32 %v1944_v11, %v1319_v12  ;;  %v3322_v17 = vadd.f32 %v1945_v15, %v1331_v13 }
 0x532   : > { %v3320_v16 = vadd.f32 %v1945_v15, %v1330_v14 }
 0x534   : > { %2206 = vmatprep.mubr.f32.mxu1 %v3320_v16 }
 0x535   : > { %v2420_v58 = vpop.eup %2419  ;;  %2207 = vmatmul.mubr.f32.vlgmr.msra.gmra.mxu1 %v3322_v17 }
 0x536   : > { %v2422_v19 = vpop.eup %2421  ;;  %v1321_v20 = vmul.f32 %v2420_v58, %v1309_v62  ;;  %2266 = vmatpush3.msra.mxu1 %v3241_v25  ;;  %v1451_v25 = vld [vmem:[%s3238_s29 + $0x8] sm:$0xff] }
 0x537   : > { %v1322_v21 = vmul.f32 %v2422_v19, %v1310_v18  ;;  %2251 = vmatprep.subr.mxu1 %v3244_v26  ;;  %2240 = vmatprep.subr.mxu0 %v1451_v25  ;;  %v1947_v19 = vld [vmem:[%s728_s19] ss:$0 sm:$0xff] }
 0x538   : > { %v1332_v22 = vmul.f32 %v1944_v11, %v1321_v20  ;;  %2267 = vmatpush3.msra.mxu1 %v3244_v26  ;;  %v1450_v26 = vld [vmem:[%s3238_s29] sm:$0xff]  ;;  %2241 = vmatpush3.msra.mxu0 %v1451_v25 }
 0x539   : > { %v1333_v23 = vmul.f32 %v1944_v11, %v1322_v21  ;;  %2252 = vmatprep.subr.mxu1 %v3250_v27  ;;  %2242 = vmatprep.subr.mxu0 %v1450_v26 }
 0x53a   : > { %v3332_v7 = vadd.f32 %v1945_v15, %v1332_v22  ;;  %2268 = vmatpush3.msra.mxu1 %v3250_v27  ;;  %2243 = vmatpush3.msra.mxu0 %v1450_v26 }
 0x53b   : > { %v1344_v8 = vadd.f32 %v1945_v15, %v1333_v23  ;;  %2253 = vmatprep.subr.mxu1 %v3255_v28 }
 0x53c   : > { %2209 = vmatprep.mubr.f32.mxu1 %v3332_v7  ;;  %2269 = vmatpush3.msra.mxu1 %v3255_v28 }
 0x53d   : > { %2210 = vmatmul.mubr.f32.gmra.mxu1 %v1344_v8  ;;  %2254 = vmatprep.subr.mxu1 %v3260_v29 }
 0x53e   : > { %2270 = vmatpush3.msra.mxu1 %v3260_v29 }
 0x53f   : > { %2255 = vmatprep.subr.mxu1 %v3265_v31 }
 0x540   : > { %2271 = vmatpush3.msra.mxu1 %v3265_v31 }
 0x541   : > { %2256 = vmatprep.subr.mxu1 %v3270_v34 }
 0x542   : > { %2272 = vmatpush3.msra.mxu1 %v3270_v34 }
 0x543   : > { %2257 = vmatprep.subr.mxu1 %v3275_v35 }
 0x544   : > { %2273 = vmatpush3.msra.mxu1 %v3275_v35 }
 0x545   : > { %2258 = vmatprep.subr.mxu1 %v3280_v36 }
 0x546   : > { %2274 = vmatpush3.msra.mxu1 %v3280_v36 }
 0x547   : > { %2259 = vmatprep.subr.mxu1 %v3285_v37 }
 0x548   : > { %2275 = vmatpush3.msra.mxu1 %v3285_v37 }
 0x549   : > { %2260 = vmatprep.subr.mxu1 %v3290_v38 }
 0x54a   : > { %2276 = vmatpush3.msra.mxu1 %v3290_v38 }
 0x54b   : > { %2261 = vmatprep.subr.mxu1 %v3295_v39 }
 0x54c   : > { %2277 = vmatpush3.msra.mxu1 %v3295_v39 }
 0x54d   : > { %2262 = vmatprep.subr.mxu1 %v3300_v40 }
 0x54e   : > { %2278 = vmatpush3.msra.mxu1 %v3300_v40 }
 0x54f   : > { %2263 = vmatprep.subr.mxu1 %v1452_v24 }
 0x550   : > { %2279 = vmatpush3.msra.mxu1 %v1452_v24 }
 0x551   : > { %2264 = vmatprep.subr.mxu1 %v1451_v25 }
 0x552   : > { %2280 = vmatpush3.msra.mxu1 %v1451_v25 }
 0x553   : > { %2265 = vmatprep.subr.mxu1 %v1450_v26 }
 0x554   : > { %2281 = vmatpush3.msra.mxu1 %v1450_v26 }
 0x5f5   : > { %v2208_v27 = vpop.f32.mrf.mxu1 }
 0x5f6   : > { %v1447_v31 = vmax.f32 %v2208_v27, 0.0 }
 0x5f7   : > { %v1427_v28 = vpop.f32.mrf.mxu1 }
 0x5f8   : > { %v1446_v29 = vmax.f32 %v1427_v28, 0.0 }
 0x5fa   : > { %2244 = vmatprep.mubr.f32.mxu0 %v1446_v29 }
 0x5fb   : > { %2245 = vmatmul.mubr.f32.vlgmr.msra.gmra.mxu0 %v1447_v31 }
 0x5fd   : > { %v2211_v34 = vpop.f32.mrf.mxu1 }
 0x5fe   : > { %v1449_v37 = vmax.f32 %v2211_v34, 0.0 }
 0x5ff   : > { %v1437_v35 = vpop.f32.mrf.mxu1 }
 0x600   : > { %v1448_v36 = vmax.f32 %v1437_v35, 0.0 }
 0x602   : > { %2247 = vmatprep.mubr.f32.mxu1 %v1448_v36 }
 0x603   : > { %2248 = vmatmul.mubr.f32.vlgmr.msra.gmra.mxu1 %v1449_v37 }
 0x6bb   : > { %v2246_v38 = vpop.f32.mrf.mxu0 }
 0x6bc   : > { %v1552_v39 = vadd.f32 %v2246_v38, %v3322_v17  ;;  %v1946_v17 = vld [vmem:[%s725_s1] ss:$0 sm:$0xff] }
 0x6bd   : > { %v1532_v40 = vpop.f32.mrf.mxu0 }
 0x6be   : > { %v1551_v41 = vadd.f32 %v1532_v40, %v3320_v16  ;;  %1557 = vadd.xlane.f32.xlu1 %v1552_v39  ;;  %v1568_v42 = vmul.f32 %v1552_v39, %v1552_v39 }
 0x6c0   : > { %1555 = vadd.xlane.f32.xlu0 %v1551_v41  ;;  %v1567_v44 = vmul.f32 %v1551_v41, %v1551_v41 }
 0x6c2   : > { %1573 = vadd.xlane.f32.xlu1 %v1568_v42 }
 0x6c3   : > { %v2249_v45 = vpop.f32.mrf.mxu1 }
 0x6c4   : > { %v1554_v46 = vadd.f32 %v2249_v45, %v1344_v8  ;;  %1571 = vadd.xlane.f32.xlu0 %v1567_v44 }
 0x6c5   : > { %v1542_v43 = vpop.f32.mrf.mxu1 }
 0x6c6   : > { %v3362_v47 = vadd.f32 %v1542_v43, %v3332_v7  ;;  %1561 = vadd.xlane.f32.xlu1 %v1554_v46  ;;  %v1570_v48 = vmul.f32 %v1554_v46, %v1554_v46 }
 0x6c8   : > { %1559 = vadd.xlane.f32.xlu0 %v3362_v47  ;;  %v1569_v49 = vmul.f32 %v3362_v47, %v3362_v47 }
 0x6ca   : > { %1577 = vadd.xlane.f32.xlu1 %v1570_v48 }
 0x6cc   : > { %1575 = vadd.xlane.f32.xlu0 %v1569_v49 }
 0x747   : > { %v1558_v50 = vpop.xlane.xlu1 %1557 }
 0x748   : > { %v1564_v52 = vmul.f32 0.03125, %v1558_v50 }
 0x749   : > { %v1556_v53 = vpop.xlane.xlu0 %1555 }
 0x74a   : > { %v1563_v55 = vmul.f32 0.03125, %v1556_v53  ;;  %v1584_v54 = vmul.f32 %v1564_v52, %v1564_v52  ;;  %v1592_v15 = vsub.f32 %v1552_v39, %v1564_v52 }
 0x74b   : > { %v1574_v51 = vpop.xlane.xlu1 %1573 }
 0x74c   : > { %v1580_v56 = vmul.f32 0.03125, %v1574_v51  ;;  %v1583_v60 = vmul.f32 %v1563_v55, %v1563_v55  ;;  %v1591_v62 = vsub.f32 %v1551_v41, %v1563_v55 }
 0x74d   : > { %v1572_v59 = vpop.xlane.xlu0 %1571 }
 0x74e   : > { %v1588_v57 = vsub.f32 %v1580_v56, %v1584_v54  ;;  %v1579_v61 = vmul.f32 0.03125, %v1572_v59 }
 0x74f   : > { %v1562_v63 = vpop.xlane.xlu1 %1561 }
 0x750   : > { %v1596_v0 = vadd.f32 1e-05, %v1588_v57  ;;  %v1587_v1 = vsub.f32 %v1579_v61, %v1583_v60  ;;  %v1566_v2 = vmul.f32 0.03125, %v1562_v63 }
 0x751   : > { %v1560_v4 = vpop.xlane.xlu0 %1559 }
 0x752   : > { %2423 = vrsqrt.f32 %v1596_v0  ;;  %v1595_v3 = vadd.f32 1e-05, %v1587_v1  ;;  %v1565_v5 = vmul.f32 0.03125, %v1560_v4  ;;  %v1586_v30 = vmul.f32 %v1566_v2, %v1566_v2 }
 0x753   : > { %v1578_v6 = vpop.xlane.xlu1 %1577  ;;  %v1594_v8 = vsub.f32 %v1554_v46, %v1566_v2 }
 0x754   : > { %2425 = vrsqrt.f32 %v1595_v3  ;;  %v1582_v9 = vmul.f32 0.03125, %v1578_v6  ;;  %v1585_v11 = vmul.f32 %v1565_v5, %v1565_v5  ;;  %v1593_v25 = vsub.f32 %v3362_v47, %v1565_v5 }
 0x755   : > { %v1576_v10 = vpop.xlane.xlu0 %1575 }
 0x756   : > { %v1590_v32 = vsub.f32 %v1582_v9, %v1586_v30  ;;  %v1581_v33 = vmul.f32 0.03125, %v1576_v10 }
 0x758   : > { %v1598_v12 = vadd.f32 1e-05, %v1590_v32  ;;  %v1589_v13 = vsub.f32 %v1581_v33, %v1585_v11 }
 0x75a   : > { %2427 = vrsqrt.f32 %v1598_v12  ;;  %v1597_v14 = vadd.f32 1e-05, %v1589_v13 }
 0x75c   : > { %2429 = vrsqrt.f32 %v1597_v14 }
 0x75f   : > { %v2424_v16 = vpop.eup %2423 }
 0x760   : > { %v1604_v58 = vmul.f32 %v2424_v16, %v1592_v15 }
 0x761   : > { %v2426_v18 = vpop.eup %2425 }
 0x762   : > { %v1615_v20 = vmul.f32 %v1946_v17, %v1604_v58  ;;  %v1603_v21 = vmul.f32 %v2426_v18, %v1591_v62 }
 0x764   : > { %v1626_v22 = vadd.f32 %v1947_v19, %v1615_v20  ;;  %v1614_v23 = vmul.f32 %v1946_v17, %v1603_v21 }
 0x766   : > { %v1625_v7 = vadd.f32 %v1947_v19, %v1614_v23  ;;  %1630 = vst [vmem:[%s714_s3 + $0x8] sm:$0xff] %v1626_v22 }
 0x767   : > { %v2428_v24 = vpop.eup %2427 }
 0x768   : > { %v1606_v26 = vmul.f32 %v2428_v24, %v1594_v8  ;;  %1629 = vst [vmem:[%s714_s3] sm:$0xff] %v1625_v7 }
 0x769   : > { %v2430_v27 = vpop.eup %2429 }
 0x76a   : > { %v1617_v28 = vmul.f32 %v1946_v17, %v1606_v26  ;;  %v1605_v29 = vmul.f32 %v2430_v27, %v1593_v25 }
 0x76c   : > { %v1628_v31 = vadd.f32 %v1947_v19, %v1617_v28  ;;  %v1616_v34 = vmul.f32 %v1946_v17, %v1605_v29 }
 0x76e   : > { %v1627_v35 = vadd.f32 %v1947_v19, %v1616_v34  ;;  %1632 = vst [vmem:[%s714_s3 + $0x18] sm:$0xff] %v1628_v31 }
 0x770   : > { %1631 = vst [vmem:[%s714_s3 + $0x10] sm:$0xff] %v1627_v35 }
 0x771   : > { %2640 = shalt.err (!%p2637_p7)
}
 0x772   : > { %s2641_s17 = scalar_lea.hbm %s3382_s28, 512  ;;  %s2645_s26 = scalar_lea.hbm %s3498_s27, 1024 }
 0x773   : > { %p2642_p10 = scmp.ne.s32.totalorder %s3382_s28, %s2641_s17  ;;  %p2646_p8 = scmp.lt.s32.totalorder %s3382_s28, %s3498_s27 }
 0x774   : > { %p2647_p0 = scmp.lt.s32.totalorder %s2645_s26, %s2641_s17 }
 0x775   : > { %p2643_p13 = pnand %p2642_p10, %p2851_p9 }
 0x776   : > { %p2648_p1 = por %p2647_p0, %p2646_p8 }
 0x777   : > { %p2644_p2 = pneg %p2643_p13 }
 0x779   : > { %p2649_p3 = pnand %p2648_p1, %p2644_p2 }
 0x77b   : > { %2652 = shalt.err (!%p2649_p3)
}
 0x77c   : > { %s2734_s1 = smov 128   ;;  %s2735_s7 = smov 8  }
 0x77d   : > { %2296 = dma.vmem_to_hbm [thread:$0]  (%p2851_p9), %s3384_s5, 512, %s3382_s28, %s1634_s15, %s2734_s1, %s2734_s1, %s2735_s7  }
 0x77e PF: > { %s3499_s22 = sld [smem:[#allocation24_spill]]  ;;  %p2321_p4 = pnand %p1914_p12, %p2858_p11 }
 0x77f   : > { %s3501_s19 = sld [smem:[#allocation27_spill]] }
 0x780   : > { %p2322_p5 = pneg %p2321_p4 }
 0x784   : > { %s1664_s3 = sand.u32 1, %s3499_s22  }
 0x785   : > { %s1665_s13 = scalar_lea.sflag [#allocation8], %s1664_s3 }
 0x786   : > { %2694 = dma.done.wait (%p2322_p5), %s1665_s13, 512  }
 0x787   : > { %2696 = vsyncadd (%p2322_p5), %s1665_s13, 4294966784  ;;  %s36_s22 = sadd.s32 1, %s3501_s19   ;;  %s3502_s29 = sld [smem:[#allocation25_spill]] }
 0x788   : > { %p33_p6 = scmp.ge.s32.totalorder %s36_s22, 4   ;;  %s3503_s19 = sld [smem:[#allocation31_spill]] }
 0x789   : > { %s3504_s10 = sld [smem:[#allocation29_spill]]  ;;  %s3505_s17 = smov %s2703_s18 }
 0x78a   : > { %s3507_s20 = smov %s2715_s21 }
 0x78b   :  { %35 = sbr.rel (!%p33_p6) target bundleno = 21 (0x15), region = 201 }
 0x78d   : > { %s3506_s18 = smov %s3502_s29 }
 0x78f   : > { %s3508_s21 = smov %s3504_s10 }
 0x790   :  { %1670 = vsyncpa [#allocation7], 1 }
 0x791   :  { %1672 = vsyncpa [#allocation7 + $0x1], 1 }
 0x792   :  { %1673 = vsyncpa [#allocation10], 1 }
 0x793   :  { %1675 = vsyncpa [#allocation10 + $0x1], 1 }
 0x794   :  { %1676 = vsyncpa [#allocation13], 1 }
 0x795   :  { %1678 = vsyncpa [#allocation13 + $0x1], 1 }
 0x796   :  { %1679 = vsyncpa [#allocation16], 1 }
 0x797   :  { %1681 = vsyncpa [#allocation16 + $0x1], 1 }
 0x798   :  { %1682 = vsyncpa [#allocation8], 1 }
 0x799   :  { %1684 = vsyncpa [#allocation8 + $0x1], 1 }

</bundles_post_ra>
